<compile_context>
chip_gen: v7x
topology: tpu7x:2x2x1
jax: 0.10.0
libtpu: 0.0.40
codegen_flags: <defaults>
</compile_context>

<pallas_src>
import jax
import jax.numpy as jnp
from jax.experimental import pallas as pl
from jax.experimental.pallas import tpu as pltpu

NITER = 5
ALPHA = 0.2


def _round_up(v, m):
    return ((v + m - 1) // m) * m


def _pad2(a, rows, cols):
    return jnp.pad(a, ((0, rows - a.shape[0]), (0, cols - a.shape[1])))


def _make_encoder3_kernel(mxu_dtype):
    def kernel(x_ref, w1_ref, b1_ref, a1_ref, ad_ref, w2_ref, b2_ref, a2_ref,
               o_ref, cur_ref, fin_ref):
        it = pl.program_id(0)                 # diffusion step (0 .. NITER-1)
        rt = pl.program_id(1)                 # row-tile index
        last = pl.num_programs(0) - 1
        tm = o_ref.shape[0]
        row0 = pl.multiple_of(rt * tm, tm)
        rows = pl.ds(row0, tm)

        # ---- it == 0: h = PReLU(x @ W1 + b1); seed diffusion state s_0 = h ----
        @pl.when(it == 0)
        def _init():
            h = jnp.dot(x_ref[...], w1_ref[...], preferred_element_type=jnp.float32)
            h = h + b1_ref[...]
            h = jnp.where(h >= 0.0, h, a1_ref[...] * h)
            cur_ref[0, rows, :] = h.astype(mxu_dtype)      # s_0 rows of this tile
            fin_ref[rows, :] = h                           # f32 accumulator: sum_i s_i

        # ---- it >= 1: s_it = (1-alpha) * AD @ s_{it-1};  fin += s_it ----
        @pl.when(it > 0)
        def _diffuse():
            wbuf = it & 1                                  # write-buffer parity
            rbuf = 1 - wbuf                                # read buffer (holds s_{it-1})
            s_prev = cur_ref[rbuf]                         # full (N_pad, H_pad)
            s_new = jnp.dot(ad_ref[...], s_prev,
                            preferred_element_type=jnp.float32)   # (tm, H_pad) f32
            s_new = (1.0 - ALPHA) * s_new
            fin_ref[rows, :] = fin_ref[rows, :] + s_new

            # s_last is never read again -> skip the dead state store on the last step.
            @pl.when(it < last)
            def _():
                cur_ref[wbuf, rows, :] = s_new.astype(mxu_dtype)

        # ---- it == last: out = PReLU(alpha * fin @ W2 + b2); lane-dense store ----
        @pl.when(it == last)
        def _project():
            f = (ALPHA * fin_ref[rows, :]).astype(mxu_dtype)
            out = jnp.dot(f, w2_ref[...], preferred_element_type=jnp.float32)
            out = out + b2_ref[...]
            out = jnp.where(out >= 0.0, out, a2_ref[...] * out)
            o_ref[...] = out.astype(o_ref.dtype)

    return kernel


def encoder3_forward(x, params, ad, *, use_bf16=True, row_tile=None,
                     vmem_budget_bytes=None):
    """x: (N, C_in) f32, ad: (N, N) f32 dense propagation matrix. Returns (N, H) f32."""
    n, cin = x.shape
    hidden = params["w1"].shape[1]

    hp = _round_up(hidden, 128)               # lane-dense hidden
    cinp = _round_up(cin, 128)

    mxu_dtype = jnp.bfloat16 if use_bf16 else jnp.float32
    mxu_bytes = int(jnp.dtype(mxu_dtype).itemsize)

    # VMEM capacity (per TensorCore); conservative fallback = v7x (most restrictive).
    try:
        vmem_capacity = int(pltpu.get_tpu_info().vmem_capacity_bytes)
    except Exception:
        vmem_capacity = 64 * 1024 * 1024
    if vmem_budget_bytes is None:
        vmem_budget_bytes = int(0.70 * vmem_capacity)

    if row_tile is not None:
        if row_tile % 128 != 0:
            raise ValueError("row_tile must be a multiple of 128")
        tm = row_tile
        n_pad = _round_up(max(n, tm), tm)
    else:
        n_pad = _round_up(n, 128)

        def est_vmem(tm_):
            fixed = (2 * n_pad * hp * mxu_bytes          # ping-pong diffusion state
                     + n_pad * hp * 4                    # f32 PPR accumulator
                     + 2 * (cinp * hp + hp * hp) * mxu_bytes
                     + 8 * hp * 4)                       # biases / PReLU slopes
            per_tile = 2 * (tm_ * n_pad * mxu_bytes      # AD row tile (double-buffered)
                            + tm_ * cinp * mxu_bytes     # x row tile
                            + tm_ * hp * 4)              # output tile
            return fixed + per_tile

        # Prefer a fully resident AD (tm = N_pad -> fetched once); otherwise stream
        # 128-aligned row tiles sized to the VMEM budget.
        tm = 128   # TODO(synk): if even the (N_pad, H_pad) state overflows VMEM, the
                   #             diffusion state itself must be streamed too.
        for cand in (n_pad, 2048, 1024, 512, 256, 128):
            if cand <= n_pad and n_pad % cand == 0 and est_vmem(cand) <= vmem_budget_bytes:
                tm = cand
                break

    num_row_tiles = n_pad // tm
    nrt = num_row_tiles

    f32 = jnp.float32
    x_p = _pad2(x.astype(f32), n_pad, cinp).astype(mxu_dtype)
    ad_p = _pad2(ad.astype(f32), n_pad, n_pad).astype(mxu_dtype)
    w1_p = _pad2(params["w1"].astype(f32), cinp, hp).astype(mxu_dtype)
    w2_p = _pad2(params["w2"].astype(f32), hp, hp).astype(mxu_dtype)
    b1_p = _pad2(params["bias1"].reshape(1, -1).astype(f32), 1, hp)
    a1_p = _pad2(params["prelu1"].reshape(1, -1).astype(f32), 1, hp)
    b2_p = _pad2(params["bias2"].reshape(1, -1).astype(f32), 1, hp)
    a2_p = _pad2(params["prelu2"].reshape(1, -1).astype(f32), 1, hp)

    ad_passes = 1 if num_row_tiles == 1 else (NITER - 1)
    flops = (2 * n_pad * cinp * hp
             + 2 * (NITER - 1) * n_pad * n_pad * hp
             + 2 * n_pad * hp * hp)
    bytes_accessed = (ad_passes * n_pad * n_pad * mxu_bytes
                      + n_pad * cinp * mxu_bytes
                      + (cinp + hp) * hp * mxu_bytes
                      + n_pad * hp * 4)
    vmem_limit = int(min(max(int(1.3 * vmem_budget_bytes), 32 * 1024 * 1024),
                         vmem_capacity - (2 * 1024 * 1024),
                         127 * 1024 * 1024))

    kernel = _make_encoder3_kernel(mxu_dtype)

    grid_spec = pltpu.PrefetchScalarGridSpec(
        num_scalar_prefetch=0,
        grid=(NITER, num_row_tiles),
        in_specs=[
            # x: only read at it == 0; park on the last-fetched block afterwards so it
            # is never re-fetched once the diffusion steps start.
            pl.BlockSpec((tm, cinp), lambda it, rt: (jnp.where(it == 0, rt, nrt - 1), 0)),
            pl.BlockSpec((cinp, hp), lambda it, rt: (0, 0)),        # W1
            pl.BlockSpec((1, hp), lambda it, rt: (0, 0)),           # bias1
            pl.BlockSpec((1, hp), lambda it, rt: (0, 0)),           # PReLU1 slope
            # AD row tile: streamed exactly once per diffusion step; when T == 1 the
            # block index is constant and AD is fetched exactly once (resident).
            pl.BlockSpec((tm, n_pad), lambda it, rt: (jnp.where(it == 0, 0, rt), 0)),
            pl.BlockSpec((hp, hp), lambda it, rt: (0, 0)),          # W2
            pl.BlockSpec((1, hp), lambda it, rt: (0, 0)),           # bias2
            pl.BlockSpec((1, hp), lambda it, rt: (0, 0)),           # PReLU2 slope
        ],
        # Output blocks are only written at the last diffusion step.
        out_specs=pl.BlockSpec(
            (tm, hp), lambda it, rt: (jnp.where(it == NITER - 1, rt, 0), 0)),
        scratch_shapes=[
            pltpu.VMEM((2, n_pad, hp), mxu_dtype),   # diffusion state ping-pong
            pltpu.VMEM((n_pad, hp), jnp.float32),    # f32 PPR accumulator
        ],
    )

    out_padded = pl.pallas_call(
        kernel,
        out_shape=jax.ShapeDtypeStruct((n_pad, hp), jnp.float32),
        grid_spec=grid_spec,
        compiler_params=pltpu.CompilerParams(
            dimension_semantics=("arbitrary", "arbitrary"),
            vmem_limit_bytes=vmem_limit,
        ),
        cost_estimate=pl.CostEstimate(
            flops=int(flops), transcendentals=0, bytes_accessed=int(bytes_accessed)),
    )(x_p, w1_p, b1_p, a1_p, ad_p, w2_p, b2_p, a2_p)

    return out_padded[:n, :hidden]


def init_params(key, in_channels, hidden_channels):
    """Parameter shapes mirroring the PyTorch module (weights stored as (in, out))."""
    k1, k2, k3, k4 = jax.random.split(key, 4)
    bound1 = 1.0 / (in_channels ** 0.5)
    bound2 = 1.0 / (hidden_channels ** 0.5)
    return {
        "w1": jax.random.uniform(k1, (in_channels, hidden_channels), jnp.float32,
                                 -bound1, bound1),
        "w2": jax.random.uniform(k2, (hidden_channels, hidden_channels), jnp.float32,
                                 -bound2, bound2),
        # The PyTorch module initializes these biases to zeros; small random values
        # are used here so the test actually exercises the bias-add path.
        "bias1": 0.1 * jax.random.normal(k3, (hidden_channels,), jnp.float32),
        "bias2": 0.1 * jax.random.normal(k4, (hidden_channels,), jnp.float32),
        "prelu1": jnp.full((hidden_channels,), 0.25, jnp.float32),  # PReLU default
        "prelu2": jnp.full((hidden_channels,), 0.25, jnp.float32),
    }


def encoder3_ref(x, params, ad):
    """Pure-JAX reference (full f32 precision) mirroring the PyTorch forward."""
    dot = lambda a, b: jnp.dot(a, b, precision=jax.lax.Precision.HIGHEST)
    h = dot(x, params["w1"]) + params["bias1"]
    h = jnp.where(h >= 0, h, params["prelu1"] * h)
    final = ALPHA * h
    current = h
    for i in range(1, NITER):
        current = dot(ad, current)
        final = final + (ALPHA * (1.0 - ALPHA) ** i) * current
    out = dot(final, params["w2"]) + params["bias2"]
    return jnp.where(out >= 0, out, params["prelu2"] * out)


if __name__ == "__main__":
    key = jax.random.PRNGKey(0)
    k_x, k_ad, k_p, k2_x, k2_ad, k2_p = jax.random.split(key, 6)

    # --- Test 1: module-sized toy shapes (N=16, Cin=8, H=32); AD resident (T=1). ---
    N, IN_CH, HIDDEN = 16, 8, 32
    x = jax.random.normal(k_x, (N, IN_CH), jnp.float32)
    ad_raw = jax.random.uniform(k_ad, (N, N), jnp.float32)
    ad = ad_raw / jnp.sum(ad_raw, axis=1, keepdims=True)   # dense stand-in for sparse AD
    params = init_params(k_p, IN_CH, HIDDEN)
    ref = encoder3_ref(x, params, ad)

    out_exact = jax.block_until_ready(encoder3_forward(x, params, ad, use_bf16=False))
    assert out_exact.shape == (N, HIDDEN)
    assert jnp.allclose(out_exact, ref, atol=1e-3, rtol=1e-3), "f32 path mismatch"

    out_fast = jax.block_until_ready(encoder3_forward(x, params, ad))  # bf16 MXU (default)
    assert out_fast.shape == (N, HIDDEN)
    assert jnp.allclose(out_fast, ref, atol=5e-2, rtol=5e-2), "bf16 path mismatch"

    # --- Test 2: force the streamed multi-row-tile path (N_pad=256, tm=128, T=2). ---
    N2, IN_CH2, HIDDEN2 = 200, 12, 32
    x2 = jax.random.normal(k2_x, (N2, IN_CH2), jnp.float32)
    ad2_raw = jax.random.uniform(k2_ad, (N2, N2), jnp.float32)
    ad2 = ad2_raw / jnp.sum(ad2_raw, axis=1, keepdims=True)
    params2 = init_params(k2_p, IN_CH2, HIDDEN2)
    ref2 = encoder3_ref(x2, params2, ad2)

    out_tiled = jax.block_until_ready(
        encoder3_forward(x2, params2, ad2, use_bf16=False, row_tile=128))
    assert out_tiled.shape == (N2, HIDDEN2)
    assert jnp.allclose(out_tiled, ref2, atol=1e-3, rtol=1e-3), "tiled f32 path mismatch"

    print("KERNEL_OK")
</pallas_src>

<mosaic_0001>
module attributes {stable_mosaic.version = 11 : i64} {
  func.func @kernel(%arg0: i32, %arg1: i32, %arg2: memref<128x128xf32, #tpu.memory_space<vmem>>, %arg3: memref<128x128xf32, #tpu.memory_space<vmem>>, %arg4: memref<1x128xf32, #tpu.memory_space<vmem>>, %arg5: memref<1x128xf32, #tpu.memory_space<vmem>>, %arg6: memref<128x128xf32, #tpu.memory_space<vmem>>, %arg7: memref<128x128xf32, #tpu.memory_space<vmem>>, %arg8: memref<1x128xf32, #tpu.memory_space<vmem>>, %arg9: memref<1x128xf32, #tpu.memory_space<vmem>>, %arg10: memref<128x128xf32, #tpu.memory_space<vmem>>, %arg11: memref<2x128x128xf32, #tpu.memory_space<vmem>>, %arg12: memref<128x128xf32, #tpu.memory_space<vmem>>) attributes {dimension_semantics = [#tpu.dimension_semantics<arbitrary>, #tpu.dimension_semantics<arbitrary>], iteration_bounds = array<i64: 5, 1>, scalar_prefetch = 0 : i64, scratch_operands = 2 : i64, tpu.core_type = #tpu.core_type<tc>, window_params = [{transform_indices = @transform_0, window_bounds = array<i64: 128, 128>}, {pipeline_mode = #tpu.pipeline_mode<synchronous>, transform_indices = @transform_1, window_bounds = array<i64: 128, 128>}, {pipeline_mode = #tpu.pipeline_mode<synchronous>, transform_indices = @transform_2, window_bounds = array<i64: 1, 128>}, {pipeline_mode = #tpu.pipeline_mode<synchronous>, transform_indices = @transform_3, window_bounds = array<i64: 1, 128>}, {transform_indices = @transform_4, window_bounds = array<i64: 128, 128>}, {pipeline_mode = #tpu.pipeline_mode<synchronous>, transform_indices = @transform_5, window_bounds = array<i64: 128, 128>}, {pipeline_mode = #tpu.pipeline_mode<synchronous>, transform_indices = @transform_6, window_bounds = array<i64: 1, 128>}, {pipeline_mode = #tpu.pipeline_mode<synchronous>, transform_indices = @transform_7, window_bounds = array<i64: 1, 128>}, {transform_indices = @transform_8, window_bounds = array<i64: 128, 128>}]} {
    %c128_i32 = arith.constant 128 : i32
    %0 = arith.muli %arg1, %c128_i32 : i32
    %1 = tpu.assume_multiple %0, 128 : i32
    %c0_i32 = arith.constant 0 : i32
    %2 = arith.cmpi eq, %arg0, %c0_i32 : i32
    %3 = arith.extui %2 : i1 to i32
    %c0_i32_0 = arith.constant 0 : i32
    %4 = arith.cmpi ne, %3, %c0_i32_0 : i32
    scf.if %4 {
      %c0 = arith.constant 0 : index
      %c0_4 = arith.constant 0 : index
      %11 = vector.load %arg2[%c0, %c0_4] : memref<128x128xf32, #tpu.memory_space<vmem>>, vector<128x128xf32>
      %c0_5 = arith.constant 0 : index
      %c0_6 = arith.constant 0 : index
      %12 = vector.load %arg3[%c0_5, %c0_6] : memref<128x128xf32, #tpu.memory_space<vmem>>, vector<128x128xf32>
      %cst = arith.constant dense<0.000000e+00> : vector<128x128xf32>
      %13 = tpu.matmul %11, %12, %cst {dimension_numbers = #tpu.dot_dimension_numbers<[1], [0], [0], [1], [0, 0, 1, 1], [], []>} : vector<128x128xf32>, vector<128x128xf32>, vector<128x128xf32> -> vector<128x128xf32>
      %c0_7 = arith.constant 0 : index
      %c0_8 = arith.constant 0 : index
      %14 = vector.load %arg4[%c0_7, %c0_8] : memref<1x128xf32, #tpu.memory_space<vmem>>, vector<1x128xf32>
      %15 = vector.broadcast %14 : vector<1x128xf32> to vector<128x128xf32>
      %16 = arith.addf %13, %15 : vector<128x128xf32>
      %cst_9 = arith.constant 0.000000e+00 : f32
      %17 = vector.broadcast %cst_9 : f32 to vector<128x128xf32>
      %18 = arith.cmpf oge, %16, %17 : vector<128x128xf32>
      %c0_10 = arith.constant 0 : index
      %c0_11 = arith.constant 0 : index
      %19 = vector.load %arg5[%c0_10, %c0_11] : memref<1x128xf32, #tpu.memory_space<vmem>>, vector<1x128xf32>
      %20 = vector.broadcast %19 : vector<1x128xf32> to vector<128x128xf32>
      %21 = arith.mulf %20, %16 : vector<128x128xf32>
      %22 = arith.select %18, %16, %21 : vector<128x128xi1>, vector<128x128xf32>
      %c0_12 = arith.constant 0 : index
      %23 = arith.index_cast %1 : i32 to index
      %c0_13 = arith.constant 0 : index
      %24 = vector.load %arg11[%c0_12, %23, %c0_13] : memref<2x128x128xf32, #tpu.memory_space<vmem>>, vector<1x128x128xf32>
      %25 = vector.shape_cast %24 : vector<1x128x128xf32> to vector<128x128xf32>
      %26 = vector.shape_cast %22 : vector<128x128xf32> to vector<1x128x128xf32>
      tpu.vector_store %arg11[%c0_12, %23, %c0_13], %26 {strides = array<i32>} : memref<2x128x128xf32, #tpu.memory_space<vmem>>, vector<1x128x128xf32>,
      %27 = arith.index_cast %1 : i32 to index
      %c0_14 = arith.constant 0 : index
      %28 = vector.load %arg12[%27, %c0_14] : memref<128x128xf32, #tpu.memory_space<vmem>>, vector<128x128xf32>
      tpu.vector_store %arg12[%27, %c0_14], %22 {strides = array<i32>} : memref<128x128xf32, #tpu.memory_space<vmem>>, vector<128x128xf32>,
    } else {
    }
    %c0_i32_1 = arith.constant 0 : i32
    %5 = arith.cmpi sgt, %arg0, %c0_i32_1 : i32
    %6 = arith.extui %5 : i1 to i32
    %c0_i32_2 = arith.constant 0 : i32
    %7 = arith.cmpi ne, %6, %c0_i32_2 : i32
    scf.if %7 {
      %c1_i32 = arith.constant 1 : i32
      %11 = arith.andi %arg0, %c1_i32 : i32
      %c1_i32_4 = arith.constant 1 : i32
      %12 = arith.subi %c1_i32_4, %11 : i32
      %13 = arith.index_cast %12 : i32 to index
      %c0 = arith.constant 0 : index
      %c0_5 = arith.constant 0 : index
      %14 = vector.load %arg11[%13, %c0, %c0_5] : memref<2x128x128xf32, #tpu.memory_space<vmem>>, vector<1x128x128xf32>
      %15 = vector.shape_cast %14 : vector<1x128x128xf32> to vector<128x128xf32>
      %c0_6 = arith.constant 0 : index
      %c0_7 = arith.constant 0 : index
      %16 = vector.load %arg6[%c0_6, %c0_7] : memref<128x128xf32, #tpu.memory_space<vmem>>, vector<128x128xf32>
      %cst = arith.constant dense<0.000000e+00> : vector<128x128xf32>
      %17 = tpu.matmul %16, %15, %cst {dimension_numbers = #tpu.dot_dimension_numbers<[1], [0], [0], [1], [0, 0, 1, 1], [], []>} : vector<128x128xf32>, vector<128x128xf32>, vector<128x128xf32> -> vector<128x128xf32>
      %cst_8 = arith.constant 8.000000e-01 : f32
      %18 = vector.broadcast %cst_8 : f32 to vector<128x128xf32>
      %19 = arith.mulf %18, %17 : vector<128x128xf32>
      %20 = arith.index_cast %1 : i32 to index
      %c0_9 = arith.constant 0 : index
      %21 = vector.load %arg12[%20, %c0_9] : memref<128x128xf32, #tpu.memory_space<vmem>>, vector<128x128xf32>
      %22 = arith.addf %21, %19 : vector<128x128xf32>
      %23 = arith.index_cast %1 : i32 to index
      %c0_10 = arith.constant 0 : index
      %24 = vector.load %arg12[%23, %c0_10] : memref<128x128xf32, #tpu.memory_space<vmem>>, vector<128x128xf32>
      tpu.vector_store %arg12[%23, %c0_10], %22 {strides = array<i32>} : memref<128x128xf32, #tpu.memory_space<vmem>>, vector<128x128xf32>,
      %c4_i32_11 = arith.constant 4 : i32
      %25 = arith.cmpi slt, %arg0, %c4_i32_11 : i32
      %26 = arith.extui %25 : i1 to i32
      %c0_i32_12 = arith.constant 0 : i32
      %27 = arith.cmpi ne, %26, %c0_i32_12 : i32
      scf.if %27 {
        %28 = arith.index_cast %11 : i32 to index
        %29 = arith.index_cast %1 : i32 to index
        %c0_13 = arith.constant 0 : index
        %30 = vector.load %arg11[%28, %29, %c0_13] : memref<2x128x128xf32, #tpu.memory_space<vmem>>, vector<1x128x128xf32>
        %31 = vector.shape_cast %30 : vector<1x128x128xf32> to vector<128x128xf32>
        %32 = vector.shape_cast %19 : vector<128x128xf32> to vector<1x128x128xf32>
        tpu.vector_store %arg11[%28, %29, %c0_13], %32 {strides = array<i32>} : memref<2x128x128xf32, #tpu.memory_space<vmem>>, vector<1x128x128xf32>,
      } else {
      }
    } else {
    }
    %c4_i32 = arith.constant 4 : i32
    %8 = arith.cmpi eq, %arg0, %c4_i32 : i32
    %9 = arith.extui %8 : i1 to i32
    %c0_i32_3 = arith.constant 0 : i32
    %10 = arith.cmpi ne, %9, %c0_i32_3 : i32
    scf.if %10 {
      %11 = arith.index_cast %1 : i32 to index
      %c0 = arith.constant 0 : index
      %12 = vector.load %arg12[%11, %c0] : memref<128x128xf32, #tpu.memory_space<vmem>>, vector<128x128xf32>
      %cst = arith.constant 2.000000e-01 : f32
      %13 = vector.broadcast %cst : f32 to vector<128x128xf32>
      %14 = arith.mulf %13, %12 : vector<128x128xf32>
      %c0_4 = arith.constant 0 : index
      %c0_5 = arith.constant 0 : index
      %15 = vector.load %arg7[%c0_4, %c0_5] : memref<128x128xf32, #tpu.memory_space<vmem>>, vector<128x128xf32>
      %cst_6 = arith.constant dense<0.000000e+00> : vector<128x128xf32>
      %16 = tpu.matmul %14, %15, %cst_6 {dimension_numbers = #tpu.dot_dimension_numbers<[1], [0], [0], [1], [0, 0, 1, 1], [], []>} : vector<128x128xf32>, vector<128x128xf32>, vector<128x128xf32> -> vector<128x128xf32>
      %c0_7 = arith.constant 0 : index
      %c0_8 = arith.constant 0 : index
      %17 = vector.load %arg8[%c0_7, %c0_8] : memref<1x128xf32, #tpu.memory_space<vmem>>, vector<1x128xf32>
      %18 = vector.broadcast %17 : vector<1x128xf32> to vector<128x128xf32>
      %19 = arith.addf %16, %18 : vector<128x128xf32>
      %cst_9 = arith.constant 0.000000e+00 : f32
      %20 = vector.broadcast %cst_9 : f32 to vector<128x128xf32>
      %21 = arith.cmpf oge, %19, %20 : vector<128x128xf32>
      %c0_10 = arith.constant 0 : index
      %c0_11 = arith.constant 0 : index
      %22 = vector.load %arg9[%c0_10, %c0_11] : memref<1x128xf32, #tpu.memory_space<vmem>>, vector<1x128xf32>
      %23 = vector.broadcast %22 : vector<1x128xf32> to vector<128x128xf32>
      %24 = arith.mulf %23, %19 : vector<128x128xf32>
      %25 = arith.select %21, %19, %24 : vector<128x128xi1>, vector<128x128xf32>
      %c0_12 = arith.constant 0 : index
      %c0_13 = arith.constant 0 : index
      %26 = vector.load %arg10[%c0_12, %c0_13] : memref<128x128xf32, #tpu.memory_space<vmem>>, vector<128x128xf32>
      tpu.vector_store %arg10[%c0_12, %c0_13], %25 {strides = array<i32>} : memref<128x128xf32, #tpu.memory_space<vmem>>, vector<128x128xf32>,
    } else {
    }
    return
  }
  func.func @transform_0(%arg0: i32, %arg1: i32) -> (i32, i32) {
    %c0_i32 = arith.constant 0 : i32
    %0 = arith.cmpi eq, %arg0, %c0_i32 : i32
    %c0_i32_0 = arith.constant 0 : i32
    %1 = arith.select %0, %arg1, %c0_i32_0 : i32
    %c0_i32_1 = arith.constant 0 : i32
    %c0_i32_2 = arith.constant 0 : i32
    return %1, %c0_i32_1 : i32, i32
  }
  func.func @transform_1(%arg0: i32, %arg1: i32) -> (i32, i32) {
    %c0_i32 = arith.constant 0 : i32
    %c0_i32_0 = arith.constant 0 : i32
    %c0_i32_1 = arith.constant 0 : i32
    return %c0_i32, %c0_i32_0 : i32, i32
  }
  func.func @transform_2(%arg0: i32, %arg1: i32) -> (i32, i32) {
    %c0_i32 = arith.constant 0 : i32
    %c0_i32_0 = arith.constant 0 : i32
    %c0_i32_1 = arith.constant 0 : i32
    return %c0_i32, %c0_i32_0 : i32, i32
  }
  func.func @transform_3(%arg0: i32, %arg1: i32) -> (i32, i32) {
    %c0_i32 = arith.constant 0 : i32
    %c0_i32_0 = arith.constant 0 : i32
    %c0_i32_1 = arith.constant 0 : i32
    return %c0_i32, %c0_i32_0 : i32, i32
  }
  func.func @transform_4(%arg0: i32, %arg1: i32) -> (i32, i32) {
    %c0_i32 = arith.constant 0 : i32
    %0 = arith.cmpi eq, %arg0, %c0_i32 : i32
    %c0_i32_0 = arith.constant 0 : i32
    %1 = arith.select %0, %c0_i32_0, %arg1 : i32
    %c0_i32_1 = arith.constant 0 : i32
    %c0_i32_2 = arith.constant 0 : i32
    return %1, %c0_i32_1 : i32, i32
  }
  func.func @transform_5(%arg0: i32, %arg1: i32) -> (i32, i32) {
    %c0_i32 = arith.constant 0 : i32
    %c0_i32_0 = arith.constant 0 : i32
    %c0_i32_1 = arith.constant 0 : i32
    return %c0_i32, %c0_i32_0 : i32, i32
  }
  func.func @transform_6(%arg0: i32, %arg1: i32) -> (i32, i32) {
    %c0_i32 = arith.constant 0 : i32
    %c0_i32_0 = arith.constant 0 : i32
    %c0_i32_1 = arith.constant 0 : i32
    return %c0_i32, %c0_i32_0 : i32, i32
  }
  func.func @transform_7(%arg0: i32, %arg1: i32) -> (i32, i32) {
    %c0_i32 = arith.constant 0 : i32
    %c0_i32_0 = arith.constant 0 : i32
    %c0_i32_1 = arith.constant 0 : i32
    return %c0_i32, %c0_i32_0 : i32, i32
  }
  func.func @transform_8(%arg0: i32, %arg1: i32) -> (i32, i32) {
    %c4_i32 = arith.constant 4 : i32
    %0 = arith.cmpi eq, %arg0, %c4_i32 : i32
    %c0_i32 = arith.constant 0 : i32
    %1 = arith.select %0, %arg1, %c0_i32 : i32
    %c0_i32_0 = arith.constant 0 : i32
    %c0_i32_1 = arith.constant 0 : i32
    return %1, %c0_i32_0 : i32, i32
  }
}

</mosaic_0001>

<bundles_post_ra>
// kernel: tpu_custom_call.1
= control target key start
LH: loop header
LB: loop body
LE: loop exit
PB: predicated region body
PF: predicated region fallthrough
CT: control target
= control target key end

     0   :  { %13 = vsyncpa [#allocation5], 0  ;;  %s2490_s0 = inlined_call_operand.hbm [shape: f32[128,128], index: 0, kind: input, shape index: {}]   ;;  %s2491_s1 = inlined_call_operand.hbm [shape: f32[128,128], index: 1, kind: input, shape index: {}]   ;;  %s2492_s2 = inlined_call_operand.vmem [shape: f32[1,128], index: 2, kind: input, shape index: {}]   ;;  %s2493_s3 = inlined_call_operand.vmem [shape: f32[1,128], index: 3, kind: input, shape index: {}]   ;;  %s2494_s4 = inlined_call_operand.hbm [shape: f32[128,128], index: 4, kind: input, shape index: {}]   ;;  %s2495_s5 = inlined_call_operand.hbm [shape: f32[128,128], index: 5, kind: input, shape index: {}]   ;;  %s2496_s6 = inlined_call_operand.vmem [shape: f32[1,128], index: 6, kind: input, shape index: {}]   ;;  %s2497_s7 = inlined_call_operand.vmem [shape: f32[1,128], index: 7, kind: input, shape index: {}]   ;;  %s2498_s8 = inlined_call_operand.hbm [shape: f32[128,128], index: 8, kind: output, shape index: {}]  }
   0x1   :  { %15 = vsyncpa [#allocation5 + $0x1], 0 }
   0x2   :  { %16 = vsyncpa [#allocation8], 0 }
   0x3   :  { %17 = vsyncpa [#allocation6], 0 }
   0x4   :  { %19 = vsyncpa [#allocation6 + $0x1], 0  ;;  %s2158_s27 = smov 0   ;;  %s2160_s28 = smov 0  }
   0x5   :  { %s2162_s29 = smov 0  }
   0x6 LB: > { %s2174_s30 = sadd.s32 4294967295, %s2102_s29   ;;  %s37_s10 = sadd.s32 1, %s2098_s28  ;;  %s2102_s29 = sphi %s2162_s29, %s25_s29   ;;  %s2098_s28 = sphi %s2160_s28, %s2529_s28   ;;  %s2094_s27 = sphi %s2158_s27, %s2528_s27  }
   0x7   : > { %p1406_p0 = scmp.ge.s32.totalorder %s2102_s29, 1  ;;  %p39_p1 = scmp.ge.s32.totalorder %s37_s10, 5 }
   0x8   : > { %p258_p2 = scmp.lt.s32.totalorder %s2102_s29, 6  ;;  %p2499_p3 = scmp.eq.s32.totalorder %s2174_s30, 0 }
   0x9   : > { %s2531_s10 = smov (%p39_p1, %s37_s10), 0  ;;  %s2104_s12 = smov [#allocation7]  }
   0xa   : > { %p2183_p4 = pnand %p1406_p0, %p258_p2  ;;  %s270_s13 = sshll.u32 %s2104_s12, 4  ;;  %s271_s13 = int_to_ptr.vmem [resolvable:$true] %s270_s13 }
   0xb   : > { %s309_s15 = sand.u32 1, %s2102_s29   ;;  %s1922_s18 = scalar_lea.hbm %s2491_s1, 2048 }
   0xc   : > { %s2507_s11 = scalar_select %p2183_p4, 1, 0 }
   0xd   : > { %p1859_p5 = pneg %p2183_p4  ;;  %p1923_p9 = scmp.ne.s32.totalorder %s2491_s1, %s1922_s18 }
   0xe   : > { %p1929_p13 = scmp.lt.u32.totalorder %s1922_s18, %s2491_s1 }
   0xf   : > { %p2191_p6 = pnand %p2499_p3, %p1859_p5 }
  0x11   : > { %s2508_s14 = scalar_select %p2191_p6, 1, 0 }
  0x12   : > { %p2501_p10 = pneg %p2191_p6 }
  0x14   : > { %p1925_p11 = pnand %p2501_p10, %p1923_p9 }
  0x16   : > { %p1926_p12 = pneg %p1925_p11 }
  0x18   : > { %p1931_p0 = pnand %p1929_p13, %p1926_p12 }
  0x1a   : > { %1934 = shalt.err (!%p1931_p0)
}
  0x1b   : > { %s1935_s23 = scalar_lea.vmem %s271_s13, 2048  ;;  %p1943_p3 = scmp.lt.s32.totalorder %s271_s13, %s271_s13 }
  0x1c   : > { %p1936_p1 = scmp.ne.s32.totalorder %s271_s13, %s1935_s23  ;;  %p1944_p8 = scmp.lt.s32.totalorder %s1935_s23, %s1935_s23 }
  0x1e   : > { %p1938_p2 = pnand %p1936_p1, %p2501_p10  ;;  %p1945_p7 = por %p1944_p8, %p1943_p3 }
  0x20   : > { %p1939_p5 = pneg %p1938_p2 }
  0x22   : > { %p1946_p4 = pnand %p1945_p7, %p1939_p5 }
  0x24   : > { %1949 = shalt.err (!%p1946_p4)
}
  0x25   : > { %s2105_s24 = smov 128   ;;  %s2106_s25 = smov 8  }
  0x26   : > { %1862 = dma.hbm_to_vmem [thread:$0]  (!%p2191_p6), %s2491_s1, 2048, %s271_s13, [#allocation8], %s2105_s24, %s2105_s24, %s2106_s25  }
  0x27   : > { %s2107_s16 = smov [#allocation4]   ;;  %p2509_p9 = scmp.lt.s32.totalorder %s2102_s29, 5 }
  0x28   : > { %s322_s17 = sshll.u32 %s2107_s16, 4  ;;  %p2510_p11 = scmp.eq.s32.totalorder %s2102_s29, 0  ;;  %s323_s17 = int_to_ptr.vmem [resolvable:$true] %s322_s17 }
  0x29   : > { %s2108_s19 = smov [#allocation10]   ;;  %s2231_s21 = scalar_lea.sflag [#allocation5], %s309_s15 }
  0x2a   : > { %p2227_p3 = pnand %p2510_p11, %p2509_p9  ;;  %s289_s20 = sshll.u32 %s2108_s19, 4  ;;  %s290_s20 = int_to_ptr.vmem [resolvable:$true] %s289_s20 }
  0x2b   : > { %s1950_s26 = scalar_lea.hbm %s2490_s0, 2048 }
  0x2c   : > { %s2511_s18 = scalar_select %p2227_p3, 1, 0 }
  0x2d   : > { %p1951_p4 = scmp.ne.s32.totalorder %s2490_s0, %s1950_s26  ;;  %p2504_p7 = pneg %p2227_p3 }
  0x2e   : > { %p1957_p13 = scmp.lt.u32.totalorder %s1950_s26, %s2490_s0 }
  0x2f   : > { %p1953_p8 = pnand %p2504_p7, %p1951_p4 }
  0x31   : > { %p1954_p12 = pneg %p1953_p8 }
  0x33   : > { %p1959_p0 = pnand %p1957_p13, %p1954_p12 }
  0x35   : > { %1962 = shalt.err (!%p1959_p0)
}
  0x36   : > { %s1963_s15 = scalar_lea.vmem %s323_s17, 2048  ;;  %s1970_s19 = scalar_lea.vmem %s323_s17, 4096 }
  0x37   : > { %p1964_p1 = scmp.ne.s32.totalorder %s323_s17, %s1963_s15  ;;  %p1971_p9 = scmp.lt.s32.totalorder %s323_s17, %s323_s17 }
  0x38   : > { %p1972_p11 = scmp.lt.s32.totalorder %s1970_s19, %s1963_s15 }
  0x39   : > { %p1966_p2 = pnand %p1964_p1, %p2504_p7 }
  0x3a   : > { %p1973_p10 = por %p1972_p11, %p1971_p9 }
  0x3b   : > { %p1967_p5 = pneg %p1966_p2 }
  0x3d   : > { %p1974_p6 = pnand %p1973_p10, %p1967_p5 }
  0x3f   : > { %1977 = shalt.err (!%p1974_p6)
}
  0x40   : > { %1869 = dma.hbm_to_vmem [thread:$0]  (!%p2227_p3), %s2490_s0, 2048, %s323_s17, %s2231_s21, %s2105_s24, %s2105_s24, %s2106_s25  }
  0x41   : > { %s1978_s13 = scalar_lea.hbm %s2495_s5, 2048  ;;  %p2512_p10 = scmp.ne.s32.totalorder %s2508_s14, 0 }
  0x42   : > { %p1979_p6 = scmp.ne.s32.totalorder %s2495_s5, %s1978_s13  ;;  %p1985_p13 = scmp.lt.u32.totalorder %s1978_s13, %s2495_s5 }
  0x43   : > { %p2513_p4 = pneg %p2512_p10 }
  0x45   : > { %p1981_p8 = pnand %p1979_p6, %p2513_p4 }
  0x47   : > { %p1982_p12 = pneg %p1981_p8 }
  0x49   : > { %p1987_p0 = pnand %p1985_p13, %p1982_p12 }
  0x4b   : > { %1990 = shalt.err (!%p1987_p0)
}
  0x4c   : > { %s1991_s17 = scalar_lea.vmem %s290_s20, 2048  ;;  %p2514_p2 = pmov %p2513_p4 }
  0x4d   : > { %p1992_p1 = scmp.ne.s32.totalorder %s290_s20, %s1991_s17  ;;  %p1999_p11 = scmp.lt.s32.totalorder %s290_s20, %s290_s20 }
  0x4e   : > { %p2000_p7 = scmp.lt.s32.totalorder %s1991_s17, %s1991_s17 }
  0x4f   : > { %p1994_p5 = pnand %p1992_p1, %p2514_p2 }
  0x50   : > { %p2001_p3 = por %p2000_p7, %p1999_p11 }
  0x51   : > { %p1995_p9 = pneg %p1994_p5 }
  0x53   : > { %p2002_p4 = pnand %p2001_p3, %p1995_p9 }
  0x55   : > { %2005 = shalt.err (!%p2002_p4)
}
  0x56   : > { %1865 = dma.hbm_to_vmem [thread:$0]  (!%p2512_p10), %s2495_s5, 2048, %s290_s20, [#allocation8], %s2105_s24, %s2105_s24, %s2106_s25  }
  0x57   : > { %s2109_s23 = smov [#allocation9]   ;;  %s2006_s16 = scalar_lea.hbm %s2494_s4, 2048 }
  0x58   : > { %s345_s26 = sshll.u32 %s2109_s23, 4  ;;  %p2007_p3 = scmp.ne.s32.totalorder %s2494_s4, %s2006_s16  ;;  %s346_s26 = int_to_ptr.vmem [resolvable:$true] %s345_s26 }
  0x59   : > { %p2515_p7 = scmp.ne.s32.totalorder %s2511_s18, 0  ;;  %p2013_p13 = scmp.lt.u32.totalorder %s2006_s16, %s2494_s4 }
  0x5b   : > { %p2516_p6 = pneg %p2515_p7 }
  0x5d   : > { %p2009_p8 = pnand %p2007_p3, %p2516_p6 }
  0x5f   : > { %p2010_p12 = pneg %p2009_p8 }
  0x61   : > { %p2015_p10 = pnand %p2013_p13, %p2010_p12 }
  0x63   : > { %2018 = shalt.err (!%p2015_p10)
}
  0x64   : > { %s2019_s20 = scalar_lea.vmem %s346_s26, 2048  ;;  %p2517_p1 = pmov %p2516_p6 }
  0x65   : > { %p2020_p0 = scmp.ne.s32.totalorder %s346_s26, %s2019_s20  ;;  %s2026_s9 = scalar_lea.vmem %s346_s26, 4096 }
  0x66   : > { %p2027_p9 = scmp.lt.s32.totalorder %s346_s26, %s346_s26  ;;  %p2028_p11 = scmp.lt.s32.totalorder %s2026_s9, %s2019_s20 }
  0x67   : > { %p2022_p2 = pnand %p2020_p0, %p2517_p1 }
  0x68   : > { %p2029_p4 = por %p2028_p11, %p2027_p9 }
  0x69   : > { %p2023_p5 = pneg %p2022_p2 }
  0x6b   : > { %p2030_p3 = pnand %p2029_p4, %p2023_p5 }
  0x6d   : > { %2033 = shalt.err (!%p2030_p3)
}
  0x6e   : > { %1872 = dma.hbm_to_vmem [thread:$0]  (!%p2515_p7), %s2494_s4, 2048, %s346_s26, %s2231_s21, %s2105_s24, %s2105_s24, %s2106_s25  }
  0x6f   : > { %p2518_p6 = scmp.ne.s32.totalorder %s2507_s11, 0 }
  0x70   : > { %s359_s13 = sand.u32 (!%p2518_p6), 1, %s2174_s30   ;;  %p2519_p8 = scmp.eq.s32.totalorder (!%p2518_p6), %s2174_s30, 0 }
  0x71   : > { %357 = sbr.rel (%p2518_p6) target bundleno = 966 (0x3c6), region = 52  ;;  %s360_s12 = scalar_lea.sflag (!%p2518_p6), [#allocation5], %s359_s13 }
  0x78   : > { %2073 = dma.done.wait (%p2519_p8), %s360_s12, 2048   ;;  %p2520_p12 = pmov %p2519_p8 }
  0x79   : > { %p2521_p13 = pmov %p2519_p8 }
  0x7a   : > { %2075 = vsyncadd (%p2520_p12), %s360_s12, 4294965248 }
  0x7b   : > { %2077 = dma.done.wait (%p2521_p13), [#allocation8], 2048   ;;  %p2522_p10 = pmov %p2519_p8 }
  0x7c   : > { %p2523_p7 = pmov %p2519_p8 }
  0x7d   : > { %2079 = vsyncadd (%p2522_p10), [#allocation8], 4294965248 }
  0x7e   : > { %2081 = dma.done.wait (%p2523_p7), %s360_s12, 2048   ;;  %p2524_p0 = pmov %p2523_p7 }
  0x80   : > { %2083 = vsyncadd (%p2524_p0), %s360_s12, 4294965248  ;;  %p2525_p1 = pmov %p2524_p0 }
  0x81   : > { %p2526_p2 = pmov %p2524_p0 }
  0x82   : > { %2085 = dma.done.wait (%p2525_p1), [#allocation8], 2048  }
  0x83   : > { %2087 = vsyncadd (%p2526_p2), [#allocation8], 4294965248  ;;  %p1417_p5 = scmp.ne.s32.totalorder %s2094_s27, 0 }
  0x84   : > { %v448_v0 = vld [vmem:[#allocation7] sm:$0xff] (!%p1417_p5)  ;;  %v449_v1 = vld [vmem:[#allocation7 + $0x8] sm:$0xff] (!%p1417_p5)  ;;  %v450_v2 = vld [vmem:[#allocation7 + $0x10] sm:$0xff] (!%p1417_p5) }
  0x85   : > { %431 = sbr.rel (%p1417_p5) target bundleno = 401 (0x191), region = 72  ;;  %v1695_v3 = vpack.c.bf16 (!%p1417_p5), %v449_v1, %v448_v0  ;;  %v451_v4 = vld [vmem:[#allocation7 + $0x18] sm:$0xff] (!%p1417_p5)  ;;  %v452_v6 = vld [vmem:[#allocation7 + $0x20] sm:$0xff] (!%p1417_p5)  ;;  %v453_v7 = vld [vmem:[#allocation7 + $0x28] sm:$0xff] (!%p1417_p5) }
  0x86   : > { %v1699_v5 = vpack.c.bf16 (!%p1417_p5), %v451_v4, %v450_v2  ;;  %v1703_v8 = vpack.c.bf16 (!%p1417_p5), %v453_v7, %v452_v6  ;;  %v432_v9 = vld [vmem:[#allocation4] sm:$0xff] (!%p1417_p5)  ;;  %v454_v11 = vld [vmem:[#allocation7 + $0x30] sm:$0xff] (!%p1417_p5)  ;;  %v455_v12 = vld [vmem:[#allocation7 + $0x38] sm:$0xff] (!%p1417_p5) }
  0x87   : > { %1696 = vmatprep.subr.bf16.mxu0 (!%p1417_p5), %v1695_v3  ;;  %1791 = vmatprep.subr.bf16.mxu1 (!%p1417_p5), %v1695_v3  ;;  %v440_v10 = vld [vmem:[#allocation4 + $0x40] sm:$0xff] (!%p1417_p5)  ;;  %v1707_v13 = vpack.c.bf16 (!%p1417_p5), %v455_v12, %v454_v11  ;;  %v457_v15 = vld [vmem:[#allocation7 + $0x48] sm:$0xff] (!%p1417_p5)  ;;  %v458_v17 = vld [vmem:[#allocation7 + $0x50] sm:$0xff] (!%p1417_p5) }
  0x88   : > { %1698 = vmatpush3.bf16.msra.mxu0 (!%p1417_p5), %v1695_v3  ;;  %1799 = vmatpush3.bf16.msra.mxu1 (!%p1417_p5), %v1695_v3  ;;  %v456_v14 = vld [vmem:[#allocation7 + $0x40] sm:$0xff] (!%p1417_p5)  ;;  %v459_v18 = vld [vmem:[#allocation7 + $0x58] sm:$0xff] (!%p1417_p5)  ;;  %v461_v21 = vld [vmem:[#allocation7 + $0x68] sm:$0xff] (!%p1417_p5) }
  0x89   : > { %1700 = vmatprep.subr.bf16.mxu0 (!%p1417_p5), %v1699_v5  ;;  %1792 = vmatprep.subr.bf16.mxu1 (!%p1417_p5), %v1699_v5  ;;  %v1711_v16 = vpack.c.bf16 (!%p1417_p5), %v457_v15, %v456_v14  ;;  %v1715_v19 = vpack.c.bf16 (!%p1417_p5), %v459_v18, %v458_v17  ;;  %v460_v20 = vld [vmem:[#allocation7 + $0x60] sm:$0xff] (!%p1417_p5)  ;;  %v462_v23 = vld [vmem:[#allocation7 + $0x70] sm:$0xff] (!%p1417_p5)  ;;  %v463_v24 = vld [vmem:[#allocation7 + $0x78] sm:$0xff] (!%p1417_p5) }
  0x8a   : > { %1559 = vmatprep.mubr.f32.mxu0 (!%p1417_p5), %v432_v9  ;;  %1571 = vmatprep.mubr.f32.mxu1 (!%p1417_p5), %v440_v10  ;;  %v1719_v22 = vpack.c.bf16 (!%p1417_p5), %v461_v21, %v460_v20  ;;  %v1723_v25 = vpack.c.bf16 (!%p1417_p5), %v463_v24, %v462_v23  ;;  %v433_v26 = vld [vmem:[#allocation4 + $0x8] sm:$0xff] (!%p1417_p5)  ;;  %v434_v28 = vld [vmem:[#allocation4 + $0x10] sm:$0xff] (!%p1417_p5)  ;;  %v435_v30 = vld [vmem:[#allocation4 + $0x18] sm:$0xff] (!%p1417_p5) }
  0x8b   : > { %v441_v27 = vld [vmem:[#allocation4 + $0x48] sm:$0xff] (!%p1417_p5)  ;;  %v442_v29 = vld [vmem:[#allocation4 + $0x50] sm:$0xff] (!%p1417_p5)  ;;  %v443_v31 = vld [vmem:[#allocation4 + $0x58] sm:$0xff] (!%p1417_p5) }
  0x8c   : > { %1702 = vmatpush3.bf16.msra.mxu0 %v1699_v5  ;;  %1800 = vmatpush3.bf16.msra.mxu1 %v1699_v5  ;;  %v436_v32 = vld [vmem:[#allocation4 + $0x20] sm:$0xff]  ;;  %v437_v34 = vld [vmem:[#allocation4 + $0x28] sm:$0xff]  ;;  %v438_v36 = vld [vmem:[#allocation4 + $0x30] sm:$0xff] }
  0x8d   : > { %1704 = vmatprep.subr.bf16.mxu0 %v1703_v8  ;;  %1793 = vmatprep.subr.bf16.mxu1 %v1703_v8  ;;  %v444_v33 = vld [vmem:[#allocation4 + $0x60] sm:$0xff]  ;;  %v445_v35 = vld [vmem:[#allocation4 + $0x68] sm:$0xff]  ;;  %v446_v37 = vld [vmem:[#allocation4 + $0x70] sm:$0xff] }
  0x8e   : > { %v439_v38 = vld [vmem:[#allocation4 + $0x38] sm:$0xff]  ;;  %v2329_v40 = vld [vmem:[%s2492_s2] ss:$0 sm:$0xff] }
  0x8f   : > { %v447_v39 = vld [vmem:[#allocation4 + $0x78] sm:$0xff]  ;;  %v2334_v42 = vld [vmem:[%s2493_s3] ss:$0 sm:$0xff] }
  0x90   : > { %1706 = vmatpush3.bf16.msra.mxu0 %v1703_v8  ;;  %1801 = vmatpush3.bf16.msra.mxu1 %v1703_v8 }
  0x91   : > { %1708 = vmatprep.subr.bf16.mxu0 %v1707_v13  ;;  %1794 = vmatprep.subr.bf16.mxu1 %v1707_v13 }
  0x94   : > { %1710 = vmatpush3.bf16.msra.mxu0 %v1707_v13  ;;  %1802 = vmatpush3.bf16.msra.mxu1 %v1707_v13 }
  0x95   : > { %1712 = vmatprep.subr.bf16.mxu0 %v1711_v16  ;;  %1795 = vmatprep.subr.bf16.mxu1 %v1711_v16 }
  0x98   : > { %1714 = vmatpush3.bf16.msra.mxu0 %v1711_v16  ;;  %1803 = vmatpush3.bf16.msra.mxu1 %v1711_v16 }
  0x99   : > { %1716 = vmatprep.subr.bf16.mxu0 %v1715_v19  ;;  %1796 = vmatprep.subr.bf16.mxu1 %v1715_v19 }
  0x9c   : > { %1718 = vmatpush3.bf16.msra.mxu0 %v1715_v19  ;;  %1804 = vmatpush3.bf16.msra.mxu1 %v1715_v19 }
  0x9d   : > { %1720 = vmatprep.subr.bf16.mxu0 %v1719_v22  ;;  %1797 = vmatprep.subr.bf16.mxu1 %v1719_v22 }
  0xa0   : > { %1722 = vmatpush3.bf16.msra.mxu0 %v1719_v22  ;;  %1805 = vmatpush3.bf16.msra.mxu1 %v1719_v22 }
  0xa1   : > { %1724 = vmatprep.subr.bf16.mxu0 %v1723_v25  ;;  %1798 = vmatprep.subr.bf16.mxu1 %v1723_v25 }
  0xa4   : > { %1726 = vmatpush3.bf16.msra.mxu0 %v1723_v25  ;;  %1806 = vmatpush3.bf16.msra.mxu1 %v1723_v25 }
  0xa7   : > { %1560 = vmatmul.mubr.f32.vlgmr.msra.gmra.mrb[0].mxu0 %v433_v26  ;;  %1572 = vmatmul.mubr.f32.vlgmr.msra.gmra.mrb[0].mxu1 %v441_v27 }
  0xa8   : > { %1562 = vmatprep.mubr.f32.mxu0 %v434_v28  ;;  %1574 = vmatprep.mubr.f32.mxu1 %v442_v29 }
  0xab   : > { %1563 = vmatmul.mubr.f32.gmra.mrb[2].mxu0 %v435_v30  ;;  %1575 = vmatmul.mubr.f32.gmra.mrb[2].mxu1 %v443_v31 }
  0xac   : > { %1565 = vmatprep.mubr.f32.mxu0 %v436_v32  ;;  %1577 = vmatprep.mubr.f32.mxu1 %v444_v33 }
  0xaf   : > { %1566 = vmatmul.mubr.f32.gmra.mrb[4].mxu0 %v437_v34  ;;  %1578 = vmatmul.mubr.f32.gmra.mrb[4].mxu1 %v445_v35 }
  0xb0   : > { %1568 = vmatprep.mubr.f32.mxu0 %v438_v36  ;;  %1580 = vmatprep.mubr.f32.mxu1 %v446_v37 }
  0xb3   : > { %1569 = vmatmul.mubr.f32.gmra.mrb[6].mxu0 %v439_v38  ;;  %1581 = vmatmul.mubr.f32.gmra.mrb[6].mxu1 %v447_v39 }
 0x17a   : > { %v1561_v41 = vpop.f32.mrb[0].mxu0  ;;  %v1573_v43 = vpop.f32.mrb[0].mxu1 }
 0x17b   : > { %v543_v44 = vadd.f32 %v1561_v41, %v2329_v40  ;;  %v583_v45 = vadd.f32 %v1573_v43, %v2329_v40  ;;  %v537_v46 = vpop.f32.mrb[1].mxu0  ;;  %v577_v47 = vpop.f32.mrb[1].mxu1 }
 0x17c   : > { %v538_v48 = vadd.f32 %v2329_v40, %v537_v46  ;;  %v578_v49 = vadd.f32 %v2329_v40, %v577_v47 }
 0x17d   : > { %vm617_vm0 = vcmp.ge.f32.partialorder %v543_v44, 0.0  ;;  %v640_v50 = vmul.f32 %v2334_v42, %v543_v44  ;;  %vm625_vm1 = vcmp.ge.f32.partialorder %v583_v45, 0.0  ;;  %v648_v51 = vmul.f32 %v2334_v42, %v583_v45 }
 0x17e   : > { %vm616_vm2 = vcmp.ge.f32.partialorder %v538_v48, 0.0  ;;  %v639_v52 = vmul.f32 %v2334_v42, %v538_v48  ;;  %vm624_vm3 = vcmp.ge.f32.partialorder %v578_v49, 0.0  ;;  %v647_v53 = vmul.f32 %v2334_v42, %v578_v49  ;;  %v1564_v54 = vpop.f32.mrb[2].mxu0  ;;  %v1576_v55 = vpop.f32.mrb[2].mxu1 }
 0x17f   : > { %v656_v56 = vsel %vm617_vm0, %v543_v44, %v640_v50  ;;  %v664_v57 = vsel %vm625_vm1, %v583_v45, %v648_v51  ;;  %v553_v58 = vadd.f32 %v1564_v54, %v2329_v40  ;;  %v593_v59 = vadd.f32 %v1576_v55, %v2329_v40  ;;  %v547_v60 = vpop.f32.mrb[3].mxu0  ;;  %v587_v61 = vpop.f32.mrb[3].mxu1 }
 0x180   : > { %673 = vst [vmem:[#allocation2 + $0x8] sm:$0xff] %v656_v56  ;;  %690 = vst [vmem:[#allocation3 + $0x8] sm:$0xff] %v656_v56  ;;  %v655_v62 = vsel %vm616_vm2, %v538_v48, %v639_v52  ;;  %v663_v63 = vsel %vm624_vm3, %v578_v49, %v647_v53  ;;  %v548_v0 = vadd.f32 %v2329_v40, %v547_v60 }
 0x181   : > { %681 = vst [vmem:[#allocation2 + $0x48] sm:$0xff] %v664_v57  ;;  %698 = vst [vmem:[#allocation3 + $0x48] sm:$0xff] %v664_v57  ;;  %v588_v1 = vadd.f32 %v2329_v40, %v587_v61  ;;  %vm619_vm4 = vcmp.ge.f32.partialorder %v553_v58, 0.0  ;;  %v642_v2 = vmul.f32 %v2334_v42, %v553_v58  ;;  %vm627_vm5 = vcmp.ge.f32.partialorder %v593_v59, 0.0 }
 0x182   : > { %672 = vst [vmem:[#allocation2] sm:$0xff] %v655_v62  ;;  %689 = vst [vmem:[#allocation3] sm:$0xff] %v655_v62  ;;  %v650_v3 = vmul.f32 %v2334_v42, %v593_v59  ;;  %vm618_vm6 = vcmp.ge.f32.partialorder %v548_v0, 0.0  ;;  %v641_v4 = vmul.f32 %v2334_v42, %v548_v0  ;;  %v1567_v6 = vpop.f32.mrb[4].mxu0  ;;  %v1579_v7 = vpop.f32.mrb[4].mxu1 }
 0x183   : > { %680 = vst [vmem:[#allocation2 + $0x40] sm:$0xff] %v663_v63  ;;  %697 = vst [vmem:[#allocation3 + $0x40] sm:$0xff] %v663_v63  ;;  %vm626_vm7 = vcmp.ge.f32.partialorder %v588_v1, 0.0  ;;  %v649_v5 = vmul.f32 %v2334_v42, %v588_v1  ;;  %v658_v8 = vsel %vm619_vm4, %v553_v58, %v642_v2  ;;  %v563_v10 = vadd.f32 %v1567_v6, %v2329_v40  ;;  %v557_v12 = vpop.f32.mrb[5].mxu0  ;;  %v597_v13 = vpop.f32.mrb[5].mxu1 }
 0x184   : > { %v666_v9 = vsel %vm627_vm5, %v593_v59, %v650_v3  ;;  %v603_v11 = vadd.f32 %v1579_v7, %v2329_v40  ;;  %675 = vst [vmem:[#allocation2 + $0x18] sm:$0xff] %v658_v8  ;;  %692 = vst [vmem:[#allocation3 + $0x18] sm:$0xff] %v658_v8  ;;  %v657_v14 = vsel %vm618_vm6, %v548_v0, %v641_v4 }
 0x185   : > { %683 = vst [vmem:[#allocation2 + $0x58] sm:$0xff] %v666_v9  ;;  %700 = vst [vmem:[#allocation3 + $0x58] sm:$0xff] %v666_v9  ;;  %v665_v15 = vsel %vm626_vm7, %v588_v1, %v649_v5  ;;  %v558_v16 = vadd.f32 %v2329_v40, %v557_v12  ;;  %v598_v17 = vadd.f32 %v2329_v40, %v597_v13  ;;  %vm621_vm8 = vcmp.ge.f32.partialorder %v563_v10, 0.0 }
 0x186   : > { %674 = vst [vmem:[#allocation2 + $0x10] sm:$0xff] %v657_v14  ;;  %691 = vst [vmem:[#allocation3 + $0x10] sm:$0xff] %v657_v14  ;;  %v644_v18 = vmul.f32 %v2334_v42, %v563_v10  ;;  %vm629_vm9 = vcmp.ge.f32.partialorder %v603_v11, 0.0  ;;  %v652_v19 = vmul.f32 %v2334_v42, %v603_v11  ;;  %v1570_v22 = vpop.f32.mrb[6].mxu0  ;;  %v1582_v23 = vpop.f32.mrb[6].mxu1 }
 0x187   : > { %682 = vst [vmem:[#allocation2 + $0x50] sm:$0xff] %v665_v15  ;;  %699 = vst [vmem:[#allocation3 + $0x50] sm:$0xff] %v665_v15  ;;  %vm620_vm10 = vcmp.ge.f32.partialorder %v558_v16, 0.0  ;;  %v643_v20 = vmul.f32 %v2334_v42, %v558_v16  ;;  %vm628_vm11 = vcmp.ge.f32.partialorder %v598_v17, 0.0  ;;  %v651_v21 = vmul.f32 %v2334_v42, %v598_v17  ;;  %v567_v28 = vpop.f32.mrb[7].mxu0  ;;  %v607_v29 = vpop.f32.mrb[7].mxu1 }
 0x188   : > { %v660_v24 = vsel %vm621_vm8, %v563_v10, %v644_v18  ;;  %v668_v25 = vsel %vm629_vm9, %v603_v11, %v652_v19  ;;  %v573_v26 = vadd.f32 %v1570_v22, %v2329_v40  ;;  %v613_v27 = vadd.f32 %v1582_v23, %v2329_v40 }
 0x189   : > { %677 = vst [vmem:[#allocation2 + $0x28] sm:$0xff] %v660_v24  ;;  %694 = vst [vmem:[#allocation3 + $0x28] sm:$0xff] %v660_v24  ;;  %v659_v30 = vsel %vm620_vm10, %v558_v16, %v643_v20  ;;  %v667_v31 = vsel %vm628_vm11, %v598_v17, %v651_v21  ;;  %v568_v32 = vadd.f32 %v2329_v40, %v567_v28 }
 0x18a   : > { %685 = vst [vmem:[#allocation2 + $0x68] sm:$0xff] %v668_v25  ;;  %702 = vst [vmem:[#allocation3 + $0x68] sm:$0xff] %v668_v25  ;;  %v608_v33 = vadd.f32 %v2329_v40, %v607_v29  ;;  %vm623_vm12 = vcmp.ge.f32.partialorder %v573_v26, 0.0  ;;  %v646_v34 = vmul.f32 %v2334_v42, %v573_v26  ;;  %vm631_vm13 = vcmp.ge.f32.partialorder %v613_v27, 0.0 }
 0x18b   : > { %676 = vst [vmem:[#allocation2 + $0x20] sm:$0xff] %v659_v30  ;;  %693 = vst [vmem:[#allocation3 + $0x20] sm:$0xff] %v659_v30  ;;  %v654_v35 = vmul.f32 %v2334_v42, %v613_v27  ;;  %vm622_vm14 = vcmp.ge.f32.partialorder %v568_v32, 0.0  ;;  %v645_v36 = vmul.f32 %v2334_v42, %v568_v32 }
 0x18c   : > { %684 = vst [vmem:[#allocation2 + $0x60] sm:$0xff] %v667_v31  ;;  %701 = vst [vmem:[#allocation3 + $0x60] sm:$0xff] %v667_v31  ;;  %vm630_vm15 = vcmp.ge.f32.partialorder %v608_v33, 0.0  ;;  %v653_v37 = vmul.f32 %v2334_v42, %v608_v33  ;;  %v662_v38 = vsel %vm623_vm12, %v573_v26, %v646_v34 }
 0x18d   : > { %v670_v39 = vsel %vm631_vm13, %v613_v27, %v654_v35  ;;  %679 = vst [vmem:[#allocation2 + $0x38] sm:$0xff] %v662_v38  ;;  %696 = vst [vmem:[#allocation3 + $0x38] sm:$0xff] %v662_v38  ;;  %v661_v40 = vsel %vm622_vm14, %v568_v32, %v645_v36 }
 0x18e   : > { %687 = vst [vmem:[#allocation2 + $0x78] sm:$0xff] %v670_v39  ;;  %704 = vst [vmem:[#allocation3 + $0x78] sm:$0xff] %v670_v39  ;;  %v669_v41 = vsel %vm630_vm15, %v608_v33, %v653_v37 }
 0x18f   : > { %678 = vst [vmem:[#allocation2 + $0x30] sm:$0xff] %v661_v40  ;;  %695 = vst [vmem:[#allocation3 + $0x30] sm:$0xff] %v661_v40 }
 0x190   : > { %686 = vst [vmem:[#allocation2 + $0x70] sm:$0xff] %v669_v41  ;;  %703 = vst [vmem:[#allocation3 + $0x70] sm:$0xff] %v669_v41 }
 0x191 PF: > { %p1420_p9 = scmp.le.s32.totalorder %s2094_s27, 0 }
 0x192   : > { %s709_s21 = sand.u32 (!%p1420_p9), 1, %s2094_s27  ;;  %v729_v42 = vld [vmem:[#allocation9] sm:$0xff] (!%p1420_p9)  ;;  %v730_v4 = vld [vmem:[#allocation9 + $0x8] sm:$0xff] (!%p1420_p9)  ;;  %v731_v6 = vld [vmem:[#allocation9 + $0x10] sm:$0xff] (!%p1420_p9)  ;;  %p1422_p11 = scmp.ge.s32.totalorder (!%p1420_p9), %s2094_s27, 4 }
 0x193   : > { %708 = sbr.rel (%p1420_p9) target bundleno = 674 (0x2a2), region = 76  ;;  %v737_v43 = vld [vmem:[#allocation9 + $0x40] sm:$0xff] (!%p1420_p9)  ;;  %s710_s26 = ssub.s32 (!%p1420_p9), 1, %s709_s21  ;;  %1615 = vmatprep.mubr.f32.mxu0 (!%p1420_p9), %v729_v42  ;;  %v738_v5 = vld [vmem:[#allocation9 + $0x48] sm:$0xff] (!%p1420_p9)  ;;  %v739_v7 = vld [vmem:[#allocation9 + $0x50] sm:$0xff] (!%p1420_p9) }
 0x194   : > { %1627 = vmatprep.mubr.f32.mxu1 (!%p1420_p9), %v737_v43  ;;  %s1421_s16 = sshll.u32 (!%p1420_p9), %s710_s26, 7  ;;  %v732_v8 = vld [vmem:[#allocation9 + $0x18] sm:$0xff] (!%p1420_p9)  ;;  %v733_v10 = vld [vmem:[#allocation9 + $0x20] sm:$0xff] (!%p1420_p9)  ;;  %v734_v12 = vld [vmem:[#allocation9 + $0x28] sm:$0xff] (!%p1420_p9) }
 0x195   : > { %s2375_s15 = scalar_lea.vmem (!%p1420_p9), [#allocation2], %s1421_s16  ;;  %v740_v9 = vld [vmem:[#allocation9 + $0x58] sm:$0xff] (!%p1420_p9)  ;;  %v741_v11 = vld [vmem:[#allocation9 + $0x60] sm:$0xff] (!%p1420_p9)  ;;  %v742_v13 = vld [vmem:[#allocation9 + $0x68] sm:$0xff] (!%p1420_p9) }
 0x196   : > { %v735_v14 = vld [vmem:[#allocation9 + $0x30] sm:$0xff] (!%p1420_p9)  ;;  %v736_v16 = vld [vmem:[#allocation9 + $0x38] sm:$0xff] (!%p1420_p9)  ;;  %v908_v18 = vld [vmem:[#allocation3 + $0x8] sm:$0xff] (!%p1420_p9) }
 0x197   : > { %v713_v44 = vld [vmem:[%s2375_s15] sm:$0xff] (!%p1420_p9)  ;;  %v714_v45 = vld [vmem:[%s2375_s15 + $0x8] sm:$0xff] (!%p1420_p9)  ;;  %v715_v46 = vld [vmem:[%s2375_s15 + $0x10] sm:$0xff] (!%p1420_p9) }
 0x198   : > { %v1727_v47 = vpack.c.bf16 (!%p1420_p9), %v714_v45, %v713_v44  ;;  %v716_v48 = vld [vmem:[%s2375_s15 + $0x18] sm:$0xff] (!%p1420_p9)  ;;  %v717_v50 = vld [vmem:[%s2375_s15 + $0x20] sm:$0xff] (!%p1420_p9)  ;;  %v718_v51 = vld [vmem:[%s2375_s15 + $0x28] sm:$0xff] (!%p1420_p9) }
 0x199   : > { %v1731_v49 = vpack.c.bf16 (!%p1420_p9), %v716_v48, %v715_v46  ;;  %v1735_v52 = vpack.c.bf16 (!%p1420_p9), %v718_v51, %v717_v50  ;;  %v719_v53 = vld [vmem:[%s2375_s15 + $0x30] sm:$0xff] (!%p1420_p9)  ;;  %v720_v54 = vld [vmem:[%s2375_s15 + $0x38] sm:$0xff] (!%p1420_p9)  ;;  %v721_v56 = vld [vmem:[%s2375_s15 + $0x40] sm:$0xff] (!%p1420_p9) }
 0x19a   : > { %1728 = vmatprep.subr.bf16.mxu0 %v1727_v47  ;;  %1807 = vmatprep.subr.bf16.mxu1 %v1727_v47  ;;  %v1739_v55 = vpack.c.bf16 %v720_v54, %v719_v53  ;;  %v722_v57 = vld [vmem:[%s2375_s15 + $0x48] sm:$0xff]  ;;  %v723_v59 = vld [vmem:[%s2375_s15 + $0x50] sm:$0xff]  ;;  %v724_v60 = vld [vmem:[%s2375_s15 + $0x58] sm:$0xff]  ;;  %s1423_s19 = sshll.u32 (!%p1422_p11), %s709_s21, 7 }
 0x19b   : > { %1730 = vmatpush3.bf16.msra.mxu0 %v1727_v47  ;;  %1815 = vmatpush3.bf16.msra.mxu1 %v1727_v47  ;;  %v1743_v58 = vpack.c.bf16 %v722_v57, %v721_v56  ;;  %v1747_v61 = vpack.c.bf16 %v724_v60, %v723_v59  ;;  %v725_v62 = vld [vmem:[%s2375_s15 + $0x60] sm:$0xff]  ;;  %v726_v63 = vld [vmem:[%s2375_s15 + $0x68] sm:$0xff]  ;;  %v727_v1 = vld [vmem:[%s2375_s15 + $0x70] sm:$0xff]  ;;  %s961_s14 = scalar_lea.vmem (!%p1422_p11), [#allocation2], %s1423_s19 }
 0x19c   : > { %1732 = vmatprep.subr.bf16.mxu0 %v1731_v49  ;;  %1808 = vmatprep.subr.bf16.mxu1 %v1731_v49  ;;  %v1751_v0 = vpack.c.bf16 %v726_v63, %v725_v62  ;;  %v728_v2 = vld [vmem:[%s2375_s15 + $0x78] sm:$0xff]  ;;  %v743_v15 = vld [vmem:[#allocation9 + $0x70] sm:$0xff]  ;;  %v916_v21 = vld [vmem:[#allocation3 + $0x48] sm:$0xff] }
 0x19d   : > { %v1755_v3 = vpack.c.bf16 %v728_v2, %v727_v1  ;;  %v744_v17 = vld [vmem:[#allocation9 + $0x78] sm:$0xff]  ;;  %v907_v22 = vld [vmem:[#allocation3] sm:$0xff]  ;;  %v909_v38 = vld [vmem:[#allocation3 + $0x10] sm:$0xff] }
 0x19e   : > { %v915_v23 = vld [vmem:[#allocation3 + $0x40] sm:$0xff]  ;;  %v910_v32 = vld [vmem:[#allocation3 + $0x18] sm:$0xff]  ;;  %v917_v39 = vld [vmem:[#allocation3 + $0x50] sm:$0xff] }
 0x19f   : > { %1734 = vmatpush3.bf16.msra.mxu0 %v1731_v49  ;;  %1816 = vmatpush3.bf16.msra.mxu1 %v1731_v49  ;;  %v918_v37 = vld [vmem:[#allocation3 + $0x58] sm:$0xff]  ;;  %v912_v48 = vld [vmem:[#allocation3 + $0x28] sm:$0xff]  ;;  %v911_v54 = vld [vmem:[#allocation3 + $0x20] sm:$0xff] }
 0x1a0   : > { %1736 = vmatprep.subr.bf16.mxu0 %v1735_v52  ;;  %1809 = vmatprep.subr.bf16.mxu1 %v1735_v52  ;;  %v920_v53 = vld [vmem:[#allocation3 + $0x68] sm:$0xff] }
 0x1a3   : > { %1738 = vmatpush3.bf16.msra.mxu0 %v1735_v52  ;;  %1817 = vmatpush3.bf16.msra.mxu1 %v1735_v52 }
 0x1a4   : > { %1740 = vmatprep.subr.bf16.mxu0 %v1739_v55  ;;  %1810 = vmatprep.subr.bf16.mxu1 %v1739_v55 }
 0x1a7   : > { %1742 = vmatpush3.bf16.msra.mxu0 %v1739_v55  ;;  %1818 = vmatpush3.bf16.msra.mxu1 %v1739_v55  ;;  %v919_v55 = vld [vmem:[#allocation3 + $0x60] sm:$0xff] }
 0x1a8   : > { %1744 = vmatprep.subr.bf16.mxu0 %v1743_v58  ;;  %1811 = vmatprep.subr.bf16.mxu1 %v1743_v58 }
 0x1ab   : > { %1746 = vmatpush3.bf16.msra.mxu0 %v1743_v58  ;;  %1819 = vmatpush3.bf16.msra.mxu1 %v1743_v58 }
 0x1ac   : > { %1748 = vmatprep.subr.bf16.mxu0 %v1747_v61  ;;  %1812 = vmatprep.subr.bf16.mxu1 %v1747_v61 }
 0x1af   : > { %1750 = vmatpush3.bf16.msra.mxu0 %v1747_v61  ;;  %1820 = vmatpush3.bf16.msra.mxu1 %v1747_v61 }
 0x1b0   : > { %1752 = vmatprep.subr.bf16.mxu0 %v1751_v0  ;;  %1813 = vmatprep.subr.bf16.mxu1 %v1751_v0 }
 0x1b3   : > { %1754 = vmatpush3.bf16.msra.mxu0 %v1751_v0  ;;  %1821 = vmatpush3.bf16.msra.mxu1 %v1751_v0  ;;  %v914_v0 = vld [vmem:[#allocation3 + $0x38] sm:$0xff] }
 0x1b4   : > { %1756 = vmatprep.subr.bf16.mxu0 %v1755_v3  ;;  %1814 = vmatprep.subr.bf16.mxu1 %v1755_v3 }
 0x1b7   : > { %1758 = vmatpush3.bf16.msra.mxu0 %v1755_v3  ;;  %1822 = vmatpush3.bf16.msra.mxu1 %v1755_v3 }
 0x1ba   : > { %1616 = vmatmul.mubr.f32.vlgmr.msra.gmra.mrb[0].mxu0 %v730_v4  ;;  %1628 = vmatmul.mubr.f32.vlgmr.msra.gmra.mrb[0].mxu1 %v738_v5  ;;  %v922_v5 = vld [vmem:[#allocation3 + $0x78] sm:$0xff] }
 0x1bb   : > { %1618 = vmatprep.mubr.f32.mxu0 %v731_v6  ;;  %1630 = vmatprep.mubr.f32.mxu1 %v739_v7  ;;  %v913_v6 = vld [vmem:[#allocation3 + $0x30] sm:$0xff] }
 0x1bc   : > { %v921_v7 = vld [vmem:[#allocation3 + $0x70] sm:$0xff] }
 0x1be   : > { %1619 = vmatmul.mubr.f32.gmra.mrb[2].mxu0 %v732_v8  ;;  %1631 = vmatmul.mubr.f32.gmra.mrb[2].mxu1 %v740_v9 }
 0x1bf   : > { %1621 = vmatprep.mubr.f32.mxu0 %v733_v10  ;;  %1633 = vmatprep.mubr.f32.mxu1 %v741_v11 }
 0x1c2   : > { %1622 = vmatmul.mubr.f32.gmra.mrb[4].mxu0 %v734_v12  ;;  %1634 = vmatmul.mubr.f32.gmra.mrb[4].mxu1 %v742_v13 }
 0x1c3   : > { %1624 = vmatprep.mubr.f32.mxu0 %v735_v14  ;;  %1636 = vmatprep.mubr.f32.mxu1 %v743_v15 }
 0x1c6   : > { %1625 = vmatmul.mubr.f32.gmra.mrb[6].mxu0 %v736_v16  ;;  %1637 = vmatmul.mubr.f32.gmra.mrb[6].mxu1 %v744_v17 }
 0x28d   : > { %v1617_v19 = vpop.f32.mrb[0].mxu0  ;;  %v1629_v20 = vpop.f32.mrb[0].mxu1 }
 0x28e   : > { %v2393_v24 = vmul.f32 0.8, %v1617_v19  ;;  %v2395_v25 = vmul.f32 0.8, %v1629_v20  ;;  %v811_v26 = vpop.f32.mrb[1].mxu0  ;;  %v851_v27 = vpop.f32.mrb[1].mxu1 }
 0x28f   : > { %v2397_v28 = vmul.f32 0.8, %v811_v26  ;;  %v2399_v29 = vmul.f32 0.8, %v851_v27 }
 0x290   : > { %v924_v30 = vadd.f32 %v908_v18, %v2393_v24  ;;  %v932_v31 = vadd.f32 %v916_v21, %v2395_v25  ;;  %963 = vst [vmem:[%s961_s14 + $0x8] sm:$0xff] (!%p1422_p11), %v2393_v24  ;;  %971 = vst [vmem:[%s961_s14 + $0x48] sm:$0xff] (!%p1422_p11), %v2395_v25 }
 0x291   : > { %v923_v33 = vadd.f32 %v907_v22, %v2397_v28  ;;  %v931_v34 = vadd.f32 %v915_v23, %v2399_v29  ;;  %v1620_v35 = vpop.f32.mrb[2].mxu0  ;;  %v1632_v36 = vpop.f32.mrb[2].mxu1  ;;  %962 = vst [vmem:[%s961_s14] sm:$0xff] (!%p1422_p11), %v2397_v28  ;;  %970 = vst [vmem:[%s961_s14 + $0x40] sm:$0xff] (!%p1422_p11), %v2399_v29 }
 0x292   : > { %940 = vst [vmem:[#allocation3 + $0x8] sm:$0xff] %v924_v30  ;;  %948 = vst [vmem:[#allocation3 + $0x48] sm:$0xff] %v932_v31  ;;  %v893_v40 = vmul.f32 0.8, %v1620_v35  ;;  %v2405_v41 = vmul.f32 0.8, %v1632_v36 }
 0x293   : > { %v821_v42 = vpop.f32.mrb[3].mxu0  ;;  %v861_v43 = vpop.f32.mrb[3].mxu1  ;;  %939 = vst [vmem:[#allocation3] sm:$0xff] %v923_v33  ;;  %947 = vst [vmem:[#allocation3 + $0x40] sm:$0xff] %v931_v34 }
 0x294   : > { %v892_v44 = vmul.f32 0.8, %v821_v42  ;;  %v900_v45 = vmul.f32 0.8, %v861_v43  ;;  %v926_v46 = vadd.f32 %v910_v32, %v893_v40  ;;  %v934_v47 = vadd.f32 %v918_v37, %v2405_v41  ;;  %965 = vst [vmem:[%s961_s14 + $0x18] sm:$0xff] (!%p1422_p11), %v893_v40  ;;  %973 = vst [vmem:[%s961_s14 + $0x58] sm:$0xff] (!%p1422_p11), %v2405_v41 }
 0x295   : > { %v1623_v51 = vpop.f32.mrb[4].mxu0  ;;  %v1635_v52 = vpop.f32.mrb[4].mxu1 }
 0x296   : > { %v925_v49 = vadd.f32 %v909_v38, %v892_v44  ;;  %v933_v50 = vadd.f32 %v917_v39, %v900_v45  ;;  %942 = vst [vmem:[#allocation3 + $0x18] sm:$0xff] %v926_v46  ;;  %950 = vst [vmem:[#allocation3 + $0x58] sm:$0xff] %v934_v47  ;;  %v895_v56 = vmul.f32 0.8, %v1623_v51  ;;  %v903_v57 = vmul.f32 0.8, %v1635_v52 }
 0x297   : > { %v831_v58 = vpop.f32.mrb[5].mxu0  ;;  %v871_v59 = vpop.f32.mrb[5].mxu1  ;;  %964 = vst [vmem:[%s961_s14 + $0x10] sm:$0xff] (!%p1422_p11), %v892_v44  ;;  %972 = vst [vmem:[%s961_s14 + $0x50] sm:$0xff] (!%p1422_p11), %v900_v45 }
 0x298   : > { %941 = vst [vmem:[#allocation3 + $0x10] sm:$0xff] %v925_v49  ;;  %949 = vst [vmem:[#allocation3 + $0x50] sm:$0xff] %v933_v50  ;;  %v894_v60 = vmul.f32 0.8, %v831_v58  ;;  %v902_v61 = vmul.f32 0.8, %v871_v59  ;;  %v928_v62 = vadd.f32 %v912_v48, %v895_v56  ;;  %v936_v63 = vadd.f32 %v920_v53, %v903_v57 }
 0x299   : > { %v1626_v3 = vpop.f32.mrb[6].mxu0  ;;  %v1638_v4 = vpop.f32.mrb[6].mxu1  ;;  %967 = vst [vmem:[%s961_s14 + $0x28] sm:$0xff] (!%p1422_p11), %v895_v56  ;;  %975 = vst [vmem:[%s961_s14 + $0x68] sm:$0xff] (!%p1422_p11), %v903_v57 }
 0x29a   : > { %v927_v1 = vadd.f32 %v911_v54, %v894_v60  ;;  %v935_v2 = vadd.f32 %v919_v55, %v902_v61  ;;  %944 = vst [vmem:[#allocation3 + $0x28] sm:$0xff] %v928_v62  ;;  %952 = vst [vmem:[#allocation3 + $0x68] sm:$0xff] %v936_v63  ;;  %v897_v8 = vmul.f32 0.8, %v1626_v3  ;;  %v905_v9 = vmul.f32 0.8, %v1638_v4 }
 0x29b   : > { %v841_v10 = vpop.f32.mrb[7].mxu0  ;;  %v881_v11 = vpop.f32.mrb[7].mxu1  ;;  %958 = sbr.rel (%p1422_p11) target bundleno = 674 (0x2a2), region = 80  ;;  %966 = vst [vmem:[%s961_s14 + $0x20] sm:$0xff] (!%p1422_p11), %v894_v60  ;;  %974 = vst [vmem:[%s961_s14 + $0x60] sm:$0xff] (!%p1422_p11), %v902_v61 }
 0x29c   : > { %943 = vst [vmem:[#allocation3 + $0x20] sm:$0xff] %v927_v1  ;;  %951 = vst [vmem:[#allocation3 + $0x60] sm:$0xff] %v935_v2  ;;  %v896_v12 = vmul.f32 0.8, %v841_v10  ;;  %v904_v13 = vmul.f32 0.8, %v881_v11  ;;  %v930_v14 = vadd.f32 %v914_v0, %v897_v8  ;;  %v938_v15 = vadd.f32 %v922_v5, %v905_v9 }
 0x29d   : > { %969 = vst [vmem:[%s961_s14 + $0x38] sm:$0xff] (!%p1422_p11), %v897_v8  ;;  %977 = vst [vmem:[%s961_s14 + $0x78] sm:$0xff] (!%p1422_p11), %v905_v9 }
 0x29e   : > { %v929_v16 = vadd.f32 %v913_v6, %v896_v12  ;;  %v937_v17 = vadd.f32 %v921_v7, %v904_v13  ;;  %946 = vst [vmem:[#allocation3 + $0x38] sm:$0xff] %v930_v14  ;;  %954 = vst [vmem:[#allocation3 + $0x78] sm:$0xff] %v938_v15 }
 0x29f   : > { %968 = vst [vmem:[%s961_s14 + $0x30] sm:$0xff] (!%p1422_p11), %v896_v12  ;;  %976 = vst [vmem:[%s961_s14 + $0x70] sm:$0xff] (!%p1422_p11), %v904_v13 }
 0x2a0   : > { %945 = vst [vmem:[#allocation3 + $0x30] sm:$0xff] %v929_v16  ;;  %953 = vst [vmem:[#allocation3 + $0x70] sm:$0xff] %v937_v17 }
 0x2a2 PF: > { %p1424_p4 = scmp.ne.s32.totalorder %s2094_s27, 4 }
 0x2a3   : > { %v1015_v18 = vld [vmem:[#allocation10] sm:$0xff] (!%p1424_p4)  ;;  %v1016_v19 = vld [vmem:[#allocation10 + $0x8] sm:$0xff] (!%p1424_p4)  ;;  %v1017_v20 = vld [vmem:[#allocation10 + $0x10] sm:$0xff] (!%p1424_p4) }
 0x2a4   : > { %981 = sbr.rel (%p1424_p4) target bundleno = 942 (0x3ae), region = 84  ;;  %v1759_v21 = vpack.c.bf16 (!%p1424_p4), %v1016_v19, %v1015_v18  ;;  %v1018_v22 = vld [vmem:[#allocation10 + $0x18] sm:$0xff] (!%p1424_p4)  ;;  %v1019_v24 = vld [vmem:[#allocation10 + $0x20] sm:$0xff] (!%p1424_p4)  ;;  %v1020_v25 = vld [vmem:[#allocation10 + $0x28] sm:$0xff] (!%p1424_p4) }
 0x2a5   : > { %v1763_v23 = vpack.c.bf16 (!%p1424_p4), %v1018_v22, %v1017_v20  ;;  %v1767_v26 = vpack.c.bf16 (!%p1424_p4), %v1020_v25, %v1019_v24  ;;  %v983_v27 = vld [vmem:[#allocation3] sm:$0xff] (!%p1424_p4)  ;;  %v1021_v29 = vld [vmem:[#allocation10 + $0x30] sm:$0xff] (!%p1424_p4)  ;;  %v1022_v30 = vld [vmem:[#allocation10 + $0x38] sm:$0xff] (!%p1424_p4) }
 0x2a6   : > { %1760 = vmatprep.subr.bf16.mxu0 (!%p1424_p4), %v1759_v21  ;;  %1823 = vmatprep.subr.bf16.mxu1 (!%p1424_p4), %v1759_v21  ;;  %v991_v28 = vld [vmem:[#allocation3 + $0x40] sm:$0xff] (!%p1424_p4)  ;;  %v999_v31 = vmul.f32 (!%p1424_p4), 0.2, %v983_v27  ;;  %v1771_v33 = vpack.c.bf16 (!%p1424_p4), %v1022_v30, %v1021_v29  ;;  %v1024_v35 = vld [vmem:[#allocation10 + $0x48] sm:$0xff] (!%p1424_p4)  ;;  %v1025_v37 = vld [vmem:[#allocation10 + $0x50] sm:$0xff] (!%p1424_p4) }
 0x2a7   : > { %1762 = vmatpush3.bf16.msra.mxu0 (!%p1424_p4), %v1759_v21  ;;  %1831 = vmatpush3.bf16.msra.mxu1 (!%p1424_p4), %v1759_v21  ;;  %v1007_v32 = vmul.f32 (!%p1424_p4), 0.2, %v991_v28  ;;  %v1023_v34 = vld [vmem:[#allocation10 + $0x40] sm:$0xff] (!%p1424_p4)  ;;  %v1026_v38 = vld [vmem:[#allocation10 + $0x58] sm:$0xff] (!%p1424_p4)  ;;  %v1028_v41 = vld [vmem:[#allocation10 + $0x68] sm:$0xff] (!%p1424_p4) }
 0x2a8   : > { %1764 = vmatprep.subr.bf16.mxu0 (!%p1424_p4), %v1763_v23  ;;  %1824 = vmatprep.subr.bf16.mxu1 (!%p1424_p4), %v1763_v23  ;;  %v1775_v36 = vpack.c.bf16 (!%p1424_p4), %v1024_v35, %v1023_v34  ;;  %v1779_v39 = vpack.c.bf16 (!%p1424_p4), %v1026_v38, %v1025_v37  ;;  %v1027_v40 = vld [vmem:[#allocation10 + $0x60] sm:$0xff] (!%p1424_p4)  ;;  %v1029_v43 = vld [vmem:[#allocation10 + $0x70] sm:$0xff] (!%p1424_p4)  ;;  %v1030_v44 = vld [vmem:[#allocation10 + $0x78] sm:$0xff] (!%p1424_p4) }
 0x2a9   : > { %1671 = vmatprep.mubr.f32.mxu0 (!%p1424_p4), %v999_v31  ;;  %1683 = vmatprep.mubr.f32.mxu1 (!%p1424_p4), %v1007_v32  ;;  %v1783_v42 = vpack.c.bf16 (!%p1424_p4), %v1028_v41, %v1027_v40  ;;  %v1787_v45 = vpack.c.bf16 (!%p1424_p4), %v1030_v44, %v1029_v43  ;;  %v984_v46 = vld [vmem:[#allocation3 + $0x8] sm:$0xff] (!%p1424_p4)  ;;  %v985_v48 = vld [vmem:[#allocation3 + $0x10] sm:$0xff] (!%p1424_p4)  ;;  %v986_v54 = vld [vmem:[#allocation3 + $0x18] sm:$0xff] (!%p1424_p4) }
 0x2aa   : > { %v992_v47 = vld [vmem:[#allocation3 + $0x48] sm:$0xff] (!%p1424_p4)  ;;  %v993_v49 = vld [vmem:[#allocation3 + $0x50] sm:$0xff] (!%p1424_p4)  ;;  %v1000_v50 = vmul.f32 (!%p1424_p4), 0.2, %v984_v46  ;;  %v1001_v52 = vmul.f32 (!%p1424_p4), 0.2, %v985_v48 }
 0x2ab   : > { %1766 = vmatpush3.bf16.msra.mxu0 %v1763_v23  ;;  %1832 = vmatpush3.bf16.msra.mxu1 %v1763_v23  ;;  %v1008_v51 = vmul.f32 0.2, %v992_v47  ;;  %v1009_v53 = vmul.f32 0.2, %v993_v49  ;;  %v994_v55 = vld [vmem:[#allocation3 + $0x58] sm:$0xff]  ;;  %v987_v56 = vld [vmem:[#allocation3 + $0x20] sm:$0xff] }
 0x2ac   : > { %1768 = vmatprep.subr.bf16.mxu0 %v1767_v26  ;;  %1825 = vmatprep.subr.bf16.mxu1 %v1767_v26  ;;  %v995_v57 = vld [vmem:[#allocation3 + $0x60] sm:$0xff]  ;;  %v1002_v58 = vmul.f32 0.2, %v986_v54  ;;  %v1010_v59 = vmul.f32 0.2, %v994_v55  ;;  %v988_v62 = vld [vmem:[#allocation3 + $0x28] sm:$0xff] }
 0x2ad   : > { %v1003_v60 = vmul.f32 0.2, %v987_v56  ;;  %v1011_v61 = vmul.f32 0.2, %v995_v57  ;;  %v996_v63 = vld [vmem:[#allocation3 + $0x68] sm:$0xff]  ;;  %v989_v0 = vld [vmem:[#allocation3 + $0x30] sm:$0xff] }
 0x2ae   : > { %v997_v1 = vld [vmem:[#allocation3 + $0x70] sm:$0xff]  ;;  %v1004_v2 = vmul.f32 0.2, %v988_v62  ;;  %v1012_v3 = vmul.f32 0.2, %v996_v63  ;;  %v990_v6 = vld [vmem:[#allocation3 + $0x38] sm:$0xff] }
 0x2af   : > { %1770 = vmatpush3.bf16.msra.mxu0 %v1767_v26  ;;  %1833 = vmatpush3.bf16.msra.mxu1 %v1767_v26  ;;  %v1005_v4 = vmul.f32 0.2, %v989_v0  ;;  %v1013_v5 = vmul.f32 0.2, %v997_v1  ;;  %v998_v7 = vld [vmem:[#allocation3 + $0x78] sm:$0xff] }
 0x2b0   : > { %1772 = vmatprep.subr.bf16.mxu0 %v1771_v33  ;;  %1826 = vmatprep.subr.bf16.mxu1 %v1771_v33  ;;  %v1006_v8 = vmul.f32 0.2, %v990_v6  ;;  %v1014_v9 = vmul.f32 0.2, %v998_v7  ;;  %v2420_v10 = vld [vmem:[%s2496_s6] ss:$0 sm:$0xff] }
 0x2b1   : > { %v2425_v12 = vld [vmem:[%s2497_s7] ss:$0 sm:$0xff] }
 0x2b3   : > { %1774 = vmatpush3.bf16.msra.mxu0 %v1771_v33  ;;  %1834 = vmatpush3.bf16.msra.mxu1 %v1771_v33 }
 0x2b4   : > { %1776 = vmatprep.subr.bf16.mxu0 %v1775_v36  ;;  %1827 = vmatprep.subr.bf16.mxu1 %v1775_v36 }
 0x2b7   : > { %1778 = vmatpush3.bf16.msra.mxu0 %v1775_v36  ;;  %1835 = vmatpush3.bf16.msra.mxu1 %v1775_v36 }
 0x2b8   : > { %1780 = vmatprep.subr.bf16.mxu0 %v1779_v39  ;;  %1828 = vmatprep.subr.bf16.mxu1 %v1779_v39 }
 0x2bb   : > { %1782 = vmatpush3.bf16.msra.mxu0 %v1779_v39  ;;  %1836 = vmatpush3.bf16.msra.mxu1 %v1779_v39 }
 0x2bc   : > { %1784 = vmatprep.subr.bf16.mxu0 %v1783_v42  ;;  %1829 = vmatprep.subr.bf16.mxu1 %v1783_v42 }
 0x2bf   : > { %1786 = vmatpush3.bf16.msra.mxu0 %v1783_v42  ;;  %1837 = vmatpush3.bf16.msra.mxu1 %v1783_v42 }
 0x2c0   : > { %1788 = vmatprep.subr.bf16.mxu0 %v1787_v45  ;;  %1830 = vmatprep.subr.bf16.mxu1 %v1787_v45 }
 0x2c3   : > { %1790 = vmatpush3.bf16.msra.mxu0 %v1787_v45  ;;  %1838 = vmatpush3.bf16.msra.mxu1 %v1787_v45 }
 0x2c6   : > { %1672 = vmatmul.mubr.f32.vlgmr.msra.gmra.mrb[0].mxu0 %v1000_v50  ;;  %1684 = vmatmul.mubr.f32.vlgmr.msra.gmra.mrb[0].mxu1 %v1008_v51 }
 0x2c7   : > { %1674 = vmatprep.mubr.f32.mxu0 %v1001_v52  ;;  %1686 = vmatprep.mubr.f32.mxu1 %v1009_v53 }
 0x2ca   : > { %1675 = vmatmul.mubr.f32.gmra.mrb[2].mxu0 %v1002_v58  ;;  %1687 = vmatmul.mubr.f32.gmra.mrb[2].mxu1 %v1010_v59 }
 0x2cb   : > { %1677 = vmatprep.mubr.f32.mxu0 %v1003_v60  ;;  %1689 = vmatprep.mubr.f32.mxu1 %v1011_v61 }
 0x2ce   : > { %1678 = vmatmul.mubr.f32.gmra.mrb[4].mxu0 %v1004_v2  ;;  %1690 = vmatmul.mubr.f32.gmra.mrb[4].mxu1 %v1012_v3 }
 0x2cf   : > { %1680 = vmatprep.mubr.f32.mxu0 %v1005_v4  ;;  %1692 = vmatprep.mubr.f32.mxu1 %v1013_v5 }
 0x2d2   : > { %1681 = vmatmul.mubr.f32.gmra.mrb[6].mxu0 %v1006_v8  ;;  %1693 = vmatmul.mubr.f32.gmra.mrb[6].mxu1 %v1014_v9 }
 0x399   : > { %v1673_v11 = vpop.f32.mrb[0].mxu0  ;;  %v1685_v13 = vpop.f32.mrb[0].mxu1 }
 0x39a   : > { %v1110_v14 = vadd.f32 %v1673_v11, %v2420_v10  ;;  %v1150_v15 = vadd.f32 %v1685_v13, %v2420_v10  ;;  %v1104_v16 = vpop.f32.mrb[1].mxu0  ;;  %v1144_v17 = vpop.f32.mrb[1].mxu1 }
 0x39b   : > { %v1105_v18 = vadd.f32 %v2420_v10, %v1104_v16  ;;  %v1145_v19 = vadd.f32 %v2420_v10, %v1144_v17 }
 0x39c   : > { %vm1184_vm0 = vcmp.ge.f32.partialorder %v1110_v14, 0.0  ;;  %v1207_v20 = vmul.f32 %v2425_v12, %v1110_v14  ;;  %vm1192_vm1 = vcmp.ge.f32.partialorder %v1150_v15, 0.0  ;;  %v1215_v21 = vmul.f32 %v2425_v12, %v1150_v15 }
 0x39d   : > { %vm1183_vm2 = vcmp.ge.f32.partialorder %v1105_v18, 0.0  ;;  %v1206_v22 = vmul.f32 %v2425_v12, %v1105_v18  ;;  %vm1191_vm3 = vcmp.ge.f32.partialorder %v1145_v19, 0.0  ;;  %v1214_v23 = vmul.f32 %v2425_v12, %v1145_v19  ;;  %v1676_v24 = vpop.f32.mrb[2].mxu0  ;;  %v1688_v25 = vpop.f32.mrb[2].mxu1 }
 0x39e   : > { %v1223_v26 = vsel %vm1184_vm0, %v1110_v14, %v1207_v20  ;;  %v1231_v27 = vsel %vm1192_vm1, %v1150_v15, %v1215_v21  ;;  %v1120_v28 = vadd.f32 %v1676_v24, %v2420_v10  ;;  %v1160_v29 = vadd.f32 %v1688_v25, %v2420_v10  ;;  %v1114_v30 = vpop.f32.mrb[3].mxu0  ;;  %v1154_v31 = vpop.f32.mrb[3].mxu1 }
 0x39f   : > { %1239 = vst [vmem:[#allocation11 + $0x8] sm:$0xff] %v1223_v26  ;;  %1247 = vst [vmem:[#allocation11 + $0x48] sm:$0xff] %v1231_v27  ;;  %v1222_v32 = vsel %vm1183_vm2, %v1105_v18, %v1206_v22  ;;  %v1230_v33 = vsel %vm1191_vm3, %v1145_v19, %v1214_v23  ;;  %v1115_v34 = vadd.f32 %v2420_v10, %v1114_v30 }
 0x3a0   : > { %v1155_v35 = vadd.f32 %v2420_v10, %v1154_v31  ;;  %1238 = vst [vmem:[#allocation11] sm:$0xff] %v1222_v32  ;;  %1246 = vst [vmem:[#allocation11 + $0x40] sm:$0xff] %v1230_v33  ;;  %vm1186_vm4 = vcmp.ge.f32.partialorder %v1120_v28, 0.0  ;;  %v1209_v36 = vmul.f32 %v2425_v12, %v1120_v28  ;;  %vm1194_vm5 = vcmp.ge.f32.partialorder %v1160_v29, 0.0 }
 0x3a1   : > { %v1217_v37 = vmul.f32 %v2425_v12, %v1160_v29  ;;  %vm1185_vm6 = vcmp.ge.f32.partialorder %v1115_v34, 0.0  ;;  %v1208_v38 = vmul.f32 %v2425_v12, %v1115_v34  ;;  %v1679_v40 = vpop.f32.mrb[4].mxu0  ;;  %v1691_v41 = vpop.f32.mrb[4].mxu1 }
 0x3a2   : > { %vm1193_vm7 = vcmp.ge.f32.partialorder %v1155_v35, 0.0  ;;  %v1216_v39 = vmul.f32 %v2425_v12, %v1155_v35  ;;  %v1225_v42 = vsel %vm1186_vm4, %v1120_v28, %v1209_v36  ;;  %v1130_v44 = vadd.f32 %v1679_v40, %v2420_v10  ;;  %v1124_v46 = vpop.f32.mrb[5].mxu0  ;;  %v1164_v47 = vpop.f32.mrb[5].mxu1 }
 0x3a3   : > { %v1233_v43 = vsel %vm1194_vm5, %v1160_v29, %v1217_v37  ;;  %v1170_v45 = vadd.f32 %v1691_v41, %v2420_v10  ;;  %1241 = vst [vmem:[#allocation11 + $0x18] sm:$0xff] %v1225_v42  ;;  %v1224_v48 = vsel %vm1185_vm6, %v1115_v34, %v1208_v38  ;;  %v1125_v50 = vadd.f32 %v2420_v10, %v1124_v46 }
 0x3a4   : > { %1249 = vst [vmem:[#allocation11 + $0x58] sm:$0xff] %v1233_v43  ;;  %v1232_v49 = vsel %vm1193_vm7, %v1155_v35, %v1216_v39  ;;  %v1165_v51 = vadd.f32 %v2420_v10, %v1164_v47  ;;  %1240 = vst [vmem:[#allocation11 + $0x10] sm:$0xff] %v1224_v48  ;;  %vm1188_vm8 = vcmp.ge.f32.partialorder %v1130_v44, 0.0  ;;  %v1211_v52 = vmul.f32 %v2425_v12, %v1130_v44 }
 0x3a5   : > { %1248 = vst [vmem:[#allocation11 + $0x50] sm:$0xff] %v1232_v49  ;;  %vm1196_vm9 = vcmp.ge.f32.partialorder %v1170_v45, 0.0  ;;  %v1219_v53 = vmul.f32 %v2425_v12, %v1170_v45  ;;  %vm1187_vm10 = vcmp.ge.f32.partialorder %v1125_v50, 0.0  ;;  %v1210_v54 = vmul.f32 %v2425_v12, %v1125_v50  ;;  %v1682_v56 = vpop.f32.mrb[6].mxu0  ;;  %v1694_v57 = vpop.f32.mrb[6].mxu1 }
 0x3a6   : > { %vm1195_vm11 = vcmp.ge.f32.partialorder %v1165_v51, 0.0  ;;  %v1218_v55 = vmul.f32 %v2425_v12, %v1165_v51  ;;  %v1227_v58 = vsel %vm1188_vm8, %v1130_v44, %v1211_v52  ;;  %v1140_v60 = vadd.f32 %v1682_v56, %v2420_v10  ;;  %v1134_v62 = vpop.f32.mrb[7].mxu0  ;;  %v1174_v63 = vpop.f32.mrb[7].mxu1 }
 0x3a7   : > { %v1235_v59 = vsel %vm1196_vm9, %v1170_v45, %v1219_v53  ;;  %v1180_v61 = vadd.f32 %v1694_v57, %v2420_v10  ;;  %1243 = vst [vmem:[#allocation11 + $0x28] sm:$0xff] %v1227_v58  ;;  %v1226_v0 = vsel %vm1187_vm10, %v1125_v50, %v1210_v54  ;;  %v1135_v2 = vadd.f32 %v2420_v10, %v1134_v62 }
 0x3a8   : > { %1251 = vst [vmem:[#allocation11 + $0x68] sm:$0xff] %v1235_v59  ;;  %v1234_v1 = vsel %vm1195_vm11, %v1165_v51, %v1218_v55  ;;  %v1175_v3 = vadd.f32 %v2420_v10, %v1174_v63  ;;  %1242 = vst [vmem:[#allocation11 + $0x20] sm:$0xff] %v1226_v0  ;;  %vm1190_vm12 = vcmp.ge.f32.partialorder %v1140_v60, 0.0  ;;  %v1213_v4 = vmul.f32 %v2425_v12, %v1140_v60 }
 0x3a9   : > { %1250 = vst [vmem:[#allocation11 + $0x60] sm:$0xff] %v1234_v1  ;;  %vm1198_vm13 = vcmp.ge.f32.partialorder %v1180_v61, 0.0  ;;  %v1221_v5 = vmul.f32 %v2425_v12, %v1180_v61  ;;  %vm1189_vm14 = vcmp.ge.f32.partialorder %v1135_v2, 0.0  ;;  %v1212_v6 = vmul.f32 %v2425_v12, %v1135_v2 }
 0x3aa   : > { %vm1197_vm15 = vcmp.ge.f32.partialorder %v1175_v3, 0.0  ;;  %v1220_v7 = vmul.f32 %v2425_v12, %v1175_v3  ;;  %v1229_v8 = vsel %vm1190_vm12, %v1140_v60, %v1213_v4 }
 0x3ab   : > { %v1237_v9 = vsel %vm1198_vm13, %v1180_v61, %v1221_v5  ;;  %1245 = vst [vmem:[#allocation11 + $0x38] sm:$0xff] %v1229_v8  ;;  %v1228_v11 = vsel %vm1189_vm14, %v1135_v2, %v1212_v6 }
 0x3ac   : > { %1253 = vst [vmem:[#allocation11 + $0x78] sm:$0xff] %v1237_v9  ;;  %v1236_v10 = vsel %vm1197_vm15, %v1175_v3, %v1220_v7  ;;  %1244 = vst [vmem:[#allocation11 + $0x30] sm:$0xff] %v1228_v11 }
 0x3ad   : > { %1252 = vst [vmem:[#allocation11 + $0x70] sm:$0xff] %v1236_v10 }
 0x3ae PF: > { %p1886_p3 = scmp.eq.s32.totalorder %s2174_s30, 4  ;;  %s2110_s22 = smov [#allocation11]  }
 0x3af   : > { %s1270_s23 = sshll.u32 %s2110_s22, 4  ;;  %s1271_s23 = int_to_ptr.vmem [resolvable:$true] %s1270_s23 }
 0x3b0   : > { %s2034_s13 = scalar_lea.vmem %s1271_s23, 2048  ;;  %s2040_s12 = scalar_lea.vmem %s1271_s23, 4096 }
 0x3b1   : > { %p2035_p6 = scmp.ne.s32.totalorder %s1271_s23, %s2034_s13  ;;  %p2041_p13 = scmp.lt.s32.totalorder %s1271_s23, %s1271_s23 }
 0x3b2   : > { %p2042_p10 = scmp.lt.s32.totalorder %s2040_s12, %s2034_s13 }
 0x3b3   : > { %p2036_p8 = pnand %p2035_p6, %p1886_p3 }
 0x3b4   : > { %p2043_p7 = por %p2042_p10, %p2041_p13 }
 0x3b5   : > { %p2037_p12 = pneg %p2036_p8 }
 0x3b7   : > { %p2044_p0 = pnand %p2043_p7, %p2037_p12 }
 0x3b9   : > { %2047 = shalt.err (!%p2044_p0)
}
 0x3ba   : > { %s2048_s25 = scalar_lea.hbm %s2498_s8, 2048 }
 0x3bb   : > { %p2049_p1 = scmp.ne.s32.totalorder %s2498_s8, %s2048_s25  ;;  %p2054_p9 = scmp.lt.u32.totalorder %s2048_s25, %s2498_s8 }
 0x3bd   : > { %p2050_p2 = pnand %p2049_p1, %p1886_p3 }
 0x3bf   : > { %p2051_p5 = pneg %p2050_p2 }
 0x3c1   : > { %p2056_p11 = pnand %p2054_p9, %p2051_p5 }
 0x3c3   : > { %2059 = shalt.err (!%p2056_p11)
}
 0x3c4   : > { %s2111_s15 = smov 128   ;;  %s2112_s19 = smov 8  }
 0x3c5   : > { %1856 = dma.vmem_to_hbm [thread:$0]  (%p1886_p3), %s1271_s23, 2048, %s2498_s8, [#allocation6], %s2111_s15, %s2111_s15, %s2112_s19  }
 0x3c6 PF: > { %p1887_p4 = scmp.ge.s32.totalorder %s2102_s29, 2  ;;  %s2527_s17 = sadd.s32 4294967294, %s2102_s29  }
 0x3c7   : > { %p1888_p6 = scmp.eq.s32.totalorder %s2527_s17, 4 }
 0x3c9   : > { %p1874_p8 = pnand %p1888_p6, %p1887_p4 }
 0x3cb   : > { %2089 = dma.done.wait (!%p1874_p8), [#allocation6], 2048  }
 0x3cc   : > { %2091 = vsyncadd (!%p1874_p8), [#allocation6], 4294965248  ;;  %s25_s29 = sadd.s32 1, %s2102_s29   ;;  %s2528_s27 = smov %s2098_s28 }
 0x3cd   : > { %p22_p12 = scmp.ge.s32.totalorder %s25_s29, 7   ;;  %s2529_s28 = smov %s2531_s10 }
 0x3cf   :  { %24 = sbr.rel (!%p22_p12) target bundleno = 6 (0x6), region = 138 }
 0x3d6   :  { %1291 = vsyncpa [#allocation5], 1 }
 0x3d7   :  { %1293 = vsyncpa [#allocation5 + $0x1], 1 }
 0x3d8   :  { %1294 = vsyncpa [#allocation8], 1 }
 0x3d9   :  { %1295 = vsyncpa [#allocation6], 1 }
 0x3da   :  { %1297 = vsyncpa [#allocation6 + $0x1], 1 }

</bundles_post_ra>
